<compile_context>
chip_gen: v7x
topology: tpu7x:2x2x1
jax: 0.10.0
libtpu: 0.0.40
codegen_flags: <defaults>
</compile_context>

<pallas_src>
import functools

import jax
import jax.numpy as jnp
from jax.experimental import pallas as pl
from jax.experimental.pallas import tpu as pltpu


# ----------------------------------------------------------------------------
# Host-side rotary / weight-folding helpers
# ----------------------------------------------------------------------------
def _rope_cos_sin(n, d):
    """ESM-style (non-interleaved) rotary tables, each (N, D), f32."""
    inv_freq = 1.0 / (10000.0 ** (jnp.arange(0, d, 2, dtype=jnp.float32) / d))
    t = jnp.arange(n, dtype=jnp.float32)
    freqs = jnp.einsum("i,j->ij", t, inv_freq)            # (N, D/2)
    emb = jnp.concatenate([freqs, freqs], axis=-1)        # (N, D)
    return jnp.cos(emb), jnp.sin(emb)


def _rope_tables_folded(n, num_heads, d, scale):
    """(4, N, C) stack [cos*scale, sin*scale, cos, sin], tiled over heads.

    The 1/sqrt(D) attention scale is pre-folded into the q tables so the
    kernel never scales the (N, N) score matrix.
    """
    cos, sin = _rope_cos_sin(n, d)
    cos_t = jnp.tile(cos, (1, num_heads))                 # (N, C)
    sin_t = jnp.tile(sin, (1, num_heads))                 # (N, C)
    return jnp.stack([cos_t * scale, sin_t * scale, cos_t, sin_t])


def _rotate_half_out_cols(m, num_heads, d):
    """Apply per-head rotate_half along the LAST (output-channel) axis of m.

    For a Linear weight W (C_in, C) this is W @ R, where R is the
    block-diagonal signed permutation with x @ R == rotate_half(x) per head,
    so rotate_half(x @ W + b) == x @ (W @ R) + rotate_half(b).
    """
    shp = m.shape
    m = m.reshape(shp[:-1] + (num_heads, d))
    m1, m2 = m[..., : d // 2], m[..., d // 2:]
    return jnp.concatenate([-m2, m1], axis=-1).reshape(shp)


# ----------------------------------------------------------------------------
# Fused kernel: one grid step == one batch element.
# ----------------------------------------------------------------------------
def _fused_attn_kernel(x_ref, wqkv_ref, bqkv_ref, wproj_ref, bproj_ref,
                       rope_ref, o_ref, o_scratch, *, num_heads, head_dim):
    c = num_heads * head_dim
    x = x_ref[0]                                          # (N, C) bf16

    # One lane-dense MXU matmul yields q, k, v and the pre-rotated q/k columns
    # (rotate_half folded into the weights host-side).  f32 accumulation.
    qkv = (jnp.dot(x, wqkv_ref[...], preferred_element_type=jnp.float32)
           + bqkv_ref[...])                               # (N, 5C) f32

    # Rotary embedding on the folded (N, C) layout; q tables carry 1/sqrt(D).
    q = qkv[:, :c] * rope_ref[0] + qkv[:, 3 * c:4 * c] * rope_ref[1]
    k = qkv[:, c:2 * c] * rope_ref[2] + qkv[:, 4 * c:5 * c] * rope_ref[3]
    v = qkv[:, 2 * c:3 * c]

    q16 = q.astype(jnp.bfloat16)
    k16 = k.astype(jnp.bfloat16)
    v16 = v.astype(jnp.bfloat16)

    # Per-head softmax attention.  Each normalized head output is written
    # straight into its lane slice of the folded (N, C) scratch so the
    # per-head temporaries (s, p, oh) die every iteration.
    for h in range(num_heads):
        sl = slice(h * head_dim, (h + 1) * head_dim)
        s = jax.lax.dot_general(q16[:, sl], k16[:, sl],
                                (((1,), (1,)), ((), ())),
                                preferred_element_type=jnp.float32)   # (N, N)
        m = jnp.max(s, axis=-1, keepdims=True)
        p = jnp.exp(s - m)
        l = jnp.sum(p, axis=-1, keepdims=True)
        oh = jnp.dot(p.astype(jnp.bfloat16), v16[:, sl],
                     preferred_element_type=jnp.float32)              # (N, D)
        # Approx EUP reciprocal (inference numerics).
        o_scratch[:, sl] = oh * pl.reciprocal(l, approx=True)

    # One full-C output projection on the folded layout; lane-dense store.
    out = (jnp.dot(o_scratch[...].astype(jnp.bfloat16), wproj_ref[...],
                   preferred_element_type=jnp.float32)
           + bproj_ref[...])
    o_ref[0] = out


def attention_forward(x, params, num_heads):
    B, N, C = x.shape
    assert C % num_heads == 0
    D = C // num_heads
    assert D % 2 == 0, "rotary embedding needs an even head_dim"
    scale = 1.0 / (D ** 0.5)

    # --- host-side parameter prep -------------------------------------------
    w_qkv = params["w_qkv"]                               # (C, 3C) (in, out)
    b_qkv = params["b_qkv"]                               # (3C,)
    w_q, w_k = w_qkv[:, :C], w_qkv[:, C:2 * C]
    b_q, b_k = b_qkv[:C], b_qkv[C:2 * C]
    # rotate_half folded into 2C extra output columns: (C, 5C) / (5C,)
    w_ext = jnp.concatenate(
        [w_qkv,
         _rotate_half_out_cols(w_q, num_heads, D),
         _rotate_half_out_cols(w_k, num_heads, D)], axis=1)
    b_ext = jnp.concatenate(
        [b_qkv,
         _rotate_half_out_cols(b_q, num_heads, D),
         _rotate_half_out_cols(b_k, num_heads, D)])

    rope = _rope_tables_folded(N, num_heads, D, scale)    # (4, N, C) f32

    # bf16 for MXU operands only; biases / rope / softmax math stay f32.
    x16 = x.astype(jnp.bfloat16)
    w_ext16 = w_ext.astype(jnp.bfloat16)                  # (C, 5C)
    w_proj16 = params["w_proj"].astype(jnp.bfloat16)      # (C, C)
    b_ext = b_ext.reshape(1, 5 * C).astype(jnp.float32)
    b_proj = params["b_proj"].reshape(1, C).astype(jnp.float32)

    kernel = functools.partial(_fused_attn_kernel,
                               num_heads=num_heads, head_dim=D)

    flops = (2 * B * N * C * (5 * C)      # extended qkv projection
             + 4 * B * N * N * C          # QK^T + PV across all heads
             + 2 * B * N * C * C)         # output projection
    bytes_accessed = (x16.size * 2 + w_ext16.size * 2 + w_proj16.size * 2
                      + b_ext.size * 4 + b_proj.size * 4 + rope.size * 4
                      + B * N * C * 4)
    cost = pl.CostEstimate(flops=flops,
                           transcendentals=B * num_heads * N * N,
                           bytes_accessed=bytes_accessed)

    # NOTE: weights/biases/rope are grid-invariant; at production C they
    # should be single-buffered (halves their VMEM footprint, matters on v7x).
    grid_spec = pltpu.PrefetchScalarGridSpec(
        num_scalar_prefetch=0,
        grid=(B,),
        in_specs=[
            pl.BlockSpec((1, N, C), lambda b: (b, 0, 0)),          # x (bf16)
            pl.BlockSpec((C, 5 * C), lambda b: (0, 0)),            # w_qkv + rot
            pl.BlockSpec((1, 5 * C), lambda b: (0, 0)),            # b_qkv + rot
            pl.BlockSpec((C, C), lambda b: (0, 0)),                # w_proj
            pl.BlockSpec((1, C), lambda b: (0, 0)),                # b_proj
            pl.BlockSpec((4, N, C), lambda b: (0, 0, 0)),          # rope tables
        ],
        out_specs=pl.BlockSpec((1, N, C), lambda b: (b, 0, 0)),
        scratch_shapes=[pltpu.VMEM((N, C), jnp.float32)],
    )

    return pl.pallas_call(
        kernel,
        out_shape=jax.ShapeDtypeStruct((B, N, C), jnp.float32),
        grid_spec=grid_spec,
        cost_estimate=cost,
        compiler_params=pltpu.CompilerParams(
            dimension_semantics=("parallel",)),
    )(x16, w_ext16, b_ext, w_proj16, b_proj, rope)


# ----------------------------------------------------------------------------
# Pure-JAX reference (for correctness checks)
# ----------------------------------------------------------------------------
def attention_reference(x, params, num_heads, mxu_dtype=jnp.float32):
    """Reference mirroring the PyTorch module.

    mxu_dtype=float32  -> exact module semantics (f32 everywhere).
    mxu_dtype=bfloat16 -> same bf16-operand / f32-accumulate numerics as the
                          Pallas kernel (tight correctness check).
    """
    B, N, C = x.shape
    D = C // num_heads
    hp = jax.lax.Precision.HIGHEST

    def mm(a, b):
        return jnp.matmul(a.astype(mxu_dtype), b.astype(mxu_dtype),
                          precision=hp, preferred_element_type=jnp.float32)

    qkv = mm(x, params["w_qkv"]) + params["b_qkv"]
    qkv = qkv.reshape(B, N, 3, num_heads, D).transpose(2, 0, 3, 1, 4)
    q, k, v = qkv[0], qkv[1], qkv[2]
    cos, sin = _rope_cos_sin(N, D)

    def rotary(t):
        t1, t2 = t[..., : D // 2], t[..., D // 2:]
        return t * cos + jnp.concatenate([-t2, t1], axis=-1) * sin

    q, k = rotary(q), rotary(k)
    s = jnp.einsum("bhnd,bhmd->bhnm", q.astype(mxu_dtype), k.astype(mxu_dtype),
                   precision=hp, preferred_element_type=jnp.float32) / (D ** 0.5)
    p = jax.nn.softmax(s, axis=-1)
    o = jnp.einsum("bhnm,bhmd->bhnd", p.astype(mxu_dtype), v.astype(mxu_dtype),
                   precision=hp, preferred_element_type=jnp.float32)
    o = o.transpose(0, 2, 1, 3).reshape(B, N, C)
    return mm(o, params["w_proj"]) + params["b_proj"]


# ----------------------------------------------------------------------------
if __name__ == "__main__":
    B, N, C, H = 2, 8, 32, 8   # head_dim = 4

    key = jax.random.PRNGKey(0)
    k1, k2, k3, k4, k5 = jax.random.split(key, 5)
    params = {
        # stored (in, out): transpose of PyTorch nn.Linear.weight
        "w_qkv": jax.random.normal(k1, (C, 3 * C), jnp.float32) / jnp.sqrt(C),
        "b_qkv": 0.02 * jax.random.normal(k2, (3 * C,), jnp.float32),
        "w_proj": jax.random.normal(k3, (C, C), jnp.float32) / jnp.sqrt(C),
        "b_proj": 0.02 * jax.random.normal(k4, (C,), jnp.float32),
    }
    x = jax.random.normal(k5, (B, N, C), jnp.float32)

    out = attention_forward(x, params, num_heads=H)
    out = jax.block_until_ready(out)
    assert out.shape == (B, N, C)

    # Tight check: reference using the kernel's bf16-MXU / f32-accum numerics.
    ref_bf16 = attention_reference(x, params, H, mxu_dtype=jnp.bfloat16)
    err_bf16 = jnp.max(jnp.abs(out - ref_bf16))
    assert jnp.allclose(out, ref_bf16, atol=5e-3, rtol=5e-3), (
        f"max abs err vs bf16-matched ref: {err_bf16}")

    # Loose check: exact-f32 module semantics (bf16 MXU operands are an
    # intentional, review-requested deviation).
    ref_f32 = attention_reference(x, params, H, mxu_dtype=jnp.float32)
    err_f32 = jnp.max(jnp.abs(out - ref_f32))
    assert jnp.allclose(out, ref_f32, atol=1e-1, rtol=1e-1), (
        f"max abs err vs f32 ref: {err_f32}")

    print("KERNEL_OK")
</pallas_src>

<mosaic_0001>
module attributes {stable_mosaic.version = 11 : i64} {
  func.func @_fused_attn_kernel(%arg0: i32, %arg1: memref<1x8x32xbf16, #tpu.memory_space<vmem>>, %arg2: memref<32x160xbf16, #tpu.memory_space<vmem>>, %arg3: memref<1x160xf32, #tpu.memory_space<vmem>>, %arg4: memref<32x32xbf16, #tpu.memory_space<vmem>>, %arg5: memref<1x32xf32, #tpu.memory_space<vmem>>, %arg6: memref<4x8x32xf32, #tpu.memory_space<vmem>>, %arg7: memref<1x8x32xf32, #tpu.memory_space<vmem>>, %arg8: memref<8x32xf32, #tpu.memory_space<vmem>>) attributes {dimension_semantics = [#tpu.dimension_semantics<parallel>], iteration_bounds = array<i64: 2>, scalar_prefetch = 0 : i64, scratch_operands = 1 : i64, tpu.core_type = #tpu.core_type<tc>, window_params = [{transform_indices = @transform_0, window_bounds = array<i64: 1, 8, 32>}, {pipeline_mode = #tpu.pipeline_mode<synchronous>, transform_indices = @transform_1, window_bounds = array<i64: 32, 160>}, {pipeline_mode = #tpu.pipeline_mode<synchronous>, transform_indices = @transform_2, window_bounds = array<i64: 1, 160>}, {pipeline_mode = #tpu.pipeline_mode<synchronous>, transform_indices = @transform_3, window_bounds = array<i64: 32, 32>}, {pipeline_mode = #tpu.pipeline_mode<synchronous>, transform_indices = @transform_4, window_bounds = array<i64: 1, 32>}, {pipeline_mode = #tpu.pipeline_mode<synchronous>, transform_indices = @transform_5, window_bounds = array<i64: 4, 8, 32>}, {transform_indices = @transform_6, window_bounds = array<i64: 1, 8, 32>}]} {
    %c0 = arith.constant 0 : index
    %c0_0 = arith.constant 0 : index
    %c0_1 = arith.constant 0 : index
    %0 = vector.load %arg1[%c0, %c0_0, %c0_1] : memref<1x8x32xbf16, #tpu.memory_space<vmem>>, vector<1x8x32xbf16>
    %1 = vector.shape_cast %0 : vector<1x8x32xbf16> to vector<8x32xbf16>
    %c0_2 = arith.constant 0 : index
    %c0_3 = arith.constant 0 : index
    %2 = vector.load %arg2[%c0_2, %c0_3] : memref<32x160xbf16, #tpu.memory_space<vmem>>, vector<32x160xbf16>
    %cst = arith.constant dense<0.000000e+00> : vector<8x160xf32>
    %3 = tpu.matmul %1, %2, %cst {dimension_numbers = #tpu.dot_dimension_numbers<[1], [0], [0], [1], [0, 0, 1, 1], [], []>} : vector<8x32xbf16>, vector<32x160xbf16>, vector<8x160xf32> -> vector<8x160xf32>
    %c0_4 = arith.constant 0 : index
    %c0_5 = arith.constant 0 : index
    %4 = vector.load %arg3[%c0_4, %c0_5] : memref<1x160xf32, #tpu.memory_space<vmem>>, vector<1x160xf32>
    %5 = vector.broadcast %4 : vector<1x160xf32> to vector<8x160xf32>
    %6 = arith.addf %3, %5 : vector<8x160xf32>
    %7 = vector.extract_strided_slice %6 {offsets = [0, 0], sizes = [8, 32], strides = [1, 1]} : vector<8x160xf32> to vector<8x32xf32>
    %c0_6 = arith.constant 0 : index
    %c0_7 = arith.constant 0 : index
    %c0_8 = arith.constant 0 : index
    %8 = vector.load %arg6[%c0_6, %c0_7, %c0_8] : memref<4x8x32xf32, #tpu.memory_space<vmem>>, vector<1x8x32xf32>
    %9 = vector.shape_cast %8 : vector<1x8x32xf32> to vector<8x32xf32>
    %10 = arith.mulf %7, %9 : vector<8x32xf32>
    %11 = vector.extract_strided_slice %6 {offsets = [0, 96], sizes = [8, 32], strides = [1, 1]} : vector<8x160xf32> to vector<8x32xf32>
    %c1 = arith.constant 1 : index
    %c0_9 = arith.constant 0 : index
    %c0_10 = arith.constant 0 : index
    %12 = vector.load %arg6[%c1, %c0_9, %c0_10] : memref<4x8x32xf32, #tpu.memory_space<vmem>>, vector<1x8x32xf32>
    %13 = vector.shape_cast %12 : vector<1x8x32xf32> to vector<8x32xf32>
    %14 = arith.mulf %11, %13 : vector<8x32xf32>
    %15 = arith.addf %10, %14 : vector<8x32xf32>
    %16 = vector.extract_strided_slice %6 {offsets = [0, 32], sizes = [8, 32], strides = [1, 1]} : vector<8x160xf32> to vector<8x32xf32>
    %c2 = arith.constant 2 : index
    %c0_11 = arith.constant 0 : index
    %c0_12 = arith.constant 0 : index
    %17 = vector.load %arg6[%c2, %c0_11, %c0_12] : memref<4x8x32xf32, #tpu.memory_space<vmem>>, vector<1x8x32xf32>
    %18 = vector.shape_cast %17 : vector<1x8x32xf32> to vector<8x32xf32>
    %19 = arith.mulf %16, %18 : vector<8x32xf32>
    %20 = vector.extract_strided_slice %6 {offsets = [0, 128], sizes = [8, 32], strides = [1, 1]} : vector<8x160xf32> to vector<8x32xf32>
    %c3 = arith.constant 3 : index
    %c0_13 = arith.constant 0 : index
    %c0_14 = arith.constant 0 : index
    %21 = vector.load %arg6[%c3, %c0_13, %c0_14] : memref<4x8x32xf32, #tpu.memory_space<vmem>>, vector<1x8x32xf32>
    %22 = vector.shape_cast %21 : vector<1x8x32xf32> to vector<8x32xf32>
    %23 = arith.mulf %20, %22 : vector<8x32xf32>
    %24 = arith.addf %19, %23 : vector<8x32xf32>
    %25 = vector.extract_strided_slice %6 {offsets = [0, 64], sizes = [8, 32], strides = [1, 1]} : vector<8x160xf32> to vector<8x32xf32>
    %26 = arith.truncf %15 : vector<8x32xf32> to vector<8x32xbf16>
    %27 = arith.truncf %24 : vector<8x32xf32> to vector<8x32xbf16>
    %28 = arith.truncf %25 : vector<8x32xf32> to vector<8x32xbf16>
    %29 = vector.extract_strided_slice %26 {offsets = [0, 0], sizes = [8, 4], strides = [1, 1]} : vector<8x32xbf16> to vector<8x4xbf16>
    %30 = vector.extract_strided_slice %27 {offsets = [0, 0], sizes = [8, 4], strides = [1, 1]} : vector<8x32xbf16> to vector<8x4xbf16>
    %cst_15 = arith.constant dense<0.000000e+00> : vector<8x8xf32>
    %31 = tpu.matmul %29, %30, %cst_15 {dimension_numbers = #tpu.dot_dimension_numbers<[1], [1], [0], [0], [0, 0, 1, 0], [], []>} : vector<8x4xbf16>, vector<8x4xbf16>, vector<8x8xf32> -> vector<8x8xf32>
    %cst_16 = arith.constant dense<0xFF800000> : vector<8xf32>
    %32 = vector.multi_reduction <maximumf>, %31, %cst_16 [1] : vector<8x8xf32> to vector<8xf32>
    %33 = vector.shape_cast %32 : vector<8xf32> to vector<8x1xf32>
    %34 = vector.broadcast %33 : vector<8x1xf32> to vector<8x8xf32>
    %35 = arith.subf %31, %34 : vector<8x8xf32>
    %36 = math.exp %35 : vector<8x8xf32>
    %cst_17 = arith.constant dense<0.000000e+00> : vector<8xf32>
    %37 = vector.multi_reduction <add>, %36, %cst_17 [1] : vector<8x8xf32> to vector<8xf32>
    %38 = vector.shape_cast %37 : vector<8xf32> to vector<8x1xf32>
    %39 = arith.truncf %36 : vector<8x8xf32> to vector<8x8xbf16>
    %40 = vector.extract_strided_slice %28 {offsets = [0, 0], sizes = [8, 4], strides = [1, 1]} : vector<8x32xbf16> to vector<8x4xbf16>
    %cst_18 = arith.constant dense<0.000000e+00> : vector<8x4xf32>
    %41 = tpu.matmul %39, %40, %cst_18 {dimension_numbers = #tpu.dot_dimension_numbers<[1], [0], [0], [1], [0, 0, 1, 1], [], []>} : vector<8x8xbf16>, vector<8x4xbf16>, vector<8x4xf32> -> vector<8x4xf32>
    %42 = tpu.reciprocal %38 {approx = true} : vector<8x1xf32> -> vector<8x1xf32>
    %43 = vector.broadcast %42 : vector<8x1xf32> to vector<8x4xf32>
    %44 = arith.mulf %41, %43 : vector<8x4xf32>
    %c0_19 = arith.constant 0 : index
    %c0_20 = arith.constant 0 : index
    %45 = vector.load %arg8[%c0_19, %c0_20] : memref<8x32xf32, #tpu.memory_space<vmem>>, vector<8x4xf32>
    tpu.vector_store %arg8[%c0_19, %c0_20], %44 {strides = array<i32>} : memref<8x32xf32, #tpu.memory_space<vmem>>, vector<8x4xf32>,
    %46 = vector.extract_strided_slice %26 {offsets = [0, 4], sizes = [8, 4], strides = [1, 1]} : vector<8x32xbf16> to vector<8x4xbf16>
    %47 = vector.extract_strided_slice %27 {offsets = [0, 4], sizes = [8, 4], strides = [1, 1]} : vector<8x32xbf16> to vector<8x4xbf16>
    %cst_21 = arith.constant dense<0.000000e+00> : vector<8x8xf32>
    %48 = tpu.matmul %46, %47, %cst_21 {dimension_numbers = #tpu.dot_dimension_numbers<[1], [1], [0], [0], [0, 0, 1, 0], [], []>} : vector<8x4xbf16>, vector<8x4xbf16>, vector<8x8xf32> -> vector<8x8xf32>
    %cst_22 = arith.constant dense<0xFF800000> : vector<8xf32>
    %49 = vector.multi_reduction <maximumf>, %48, %cst_22 [1] : vector<8x8xf32> to vector<8xf32>
    %50 = vector.shape_cast %49 : vector<8xf32> to vector<8x1xf32>
    %51 = vector.broadcast %50 : vector<8x1xf32> to vector<8x8xf32>
    %52 = arith.subf %48, %51 : vector<8x8xf32>
    %53 = math.exp %52 : vector<8x8xf32>
    %cst_23 = arith.constant dense<0.000000e+00> : vector<8xf32>
    %54 = vector.multi_reduction <add>, %53, %cst_23 [1] : vector<8x8xf32> to vector<8xf32>
    %55 = vector.shape_cast %54 : vector<8xf32> to vector<8x1xf32>
    %56 = arith.truncf %53 : vector<8x8xf32> to vector<8x8xbf16>
    %57 = vector.extract_strided_slice %28 {offsets = [0, 4], sizes = [8, 4], strides = [1, 1]} : vector<8x32xbf16> to vector<8x4xbf16>
    %cst_24 = arith.constant dense<0.000000e+00> : vector<8x4xf32>
    %58 = tpu.matmul %56, %57, %cst_24 {dimension_numbers = #tpu.dot_dimension_numbers<[1], [0], [0], [1], [0, 0, 1, 1], [], []>} : vector<8x8xbf16>, vector<8x4xbf16>, vector<8x4xf32> -> vector<8x4xf32>
    %59 = tpu.reciprocal %55 {approx = true} : vector<8x1xf32> -> vector<8x1xf32>
    %60 = vector.broadcast %59 : vector<8x1xf32> to vector<8x4xf32>
    %61 = arith.mulf %58, %60 : vector<8x4xf32>
    %c0_25 = arith.constant 0 : index
    %c4 = arith.constant 4 : index
    %62 = vector.load %arg8[%c0_25, %c4] : memref<8x32xf32, #tpu.memory_space<vmem>>, vector<8x4xf32>
    tpu.vector_store %arg8[%c0_25, %c4], %61 {strides = array<i32>} : memref<8x32xf32, #tpu.memory_space<vmem>>, vector<8x4xf32>,
    %63 = vector.extract_strided_slice %26 {offsets = [0, 8], sizes = [8, 4], strides = [1, 1]} : vector<8x32xbf16> to vector<8x4xbf16>
    %64 = vector.extract_strided_slice %27 {offsets = [0, 8], sizes = [8, 4], strides = [1, 1]} : vector<8x32xbf16> to vector<8x4xbf16>
    %cst_26 = arith.constant dense<0.000000e+00> : vector<8x8xf32>
    %65 = tpu.matmul %63, %64, %cst_26 {dimension_numbers = #tpu.dot_dimension_numbers<[1], [1], [0], [0], [0, 0, 1, 0], [], []>} : vector<8x4xbf16>, vector<8x4xbf16>, vector<8x8xf32> -> vector<8x8xf32>
    %cst_27 = arith.constant dense<0xFF800000> : vector<8xf32>
    %66 = vector.multi_reduction <maximumf>, %65, %cst_27 [1] : vector<8x8xf32> to vector<8xf32>
    %67 = vector.shape_cast %66 : vector<8xf32> to vector<8x1xf32>
    %68 = vector.broadcast %67 : vector<8x1xf32> to vector<8x8xf32>
    %69 = arith.subf %65, %68 : vector<8x8xf32>
    %70 = math.exp %69 : vector<8x8xf32>
    %cst_28 = arith.constant dense<0.000000e+00> : vector<8xf32>
    %71 = vector.multi_reduction <add>, %70, %cst_28 [1] : vector<8x8xf32> to vector<8xf32>
    %72 = vector.shape_cast %71 : vector<8xf32> to vector<8x1xf32>
    %73 = arith.truncf %70 : vector<8x8xf32> to vector<8x8xbf16>
    %74 = vector.extract_strided_slice %28 {offsets = [0, 8], sizes = [8, 4], strides = [1, 1]} : vector<8x32xbf16> to vector<8x4xbf16>
    %cst_29 = arith.constant dense<0.000000e+00> : vector<8x4xf32>
    %75 = tpu.matmul %73, %74, %cst_29 {dimension_numbers = #tpu.dot_dimension_numbers<[1], [0], [0], [1], [0, 0, 1, 1], [], []>} : vector<8x8xbf16>, vector<8x4xbf16>, vector<8x4xf32> -> vector<8x4xf32>
    %76 = tpu.reciprocal %72 {approx = true} : vector<8x1xf32> -> vector<8x1xf32>
    %77 = vector.broadcast %76 : vector<8x1xf32> to vector<8x4xf32>
    %78 = arith.mulf %75, %77 : vector<8x4xf32>
    %c0_30 = arith.constant 0 : index
    %c8 = arith.constant 8 : index
    %79 = vector.load %arg8[%c0_30, %c8] : memref<8x32xf32, #tpu.memory_space<vmem>>, vector<8x4xf32>
    tpu.vector_store %arg8[%c0_30, %c8], %78 {strides = array<i32>} : memref<8x32xf32, #tpu.memory_space<vmem>>, vector<8x4xf32>,
    %80 = vector.extract_strided_slice %26 {offsets = [0, 12], sizes = [8, 4], strides = [1, 1]} : vector<8x32xbf16> to vector<8x4xbf16>
    %81 = vector.extract_strided_slice %27 {offsets = [0, 12], sizes = [8, 4], strides = [1, 1]} : vector<8x32xbf16> to vector<8x4xbf16>
    %cst_31 = arith.constant dense<0.000000e+00> : vector<8x8xf32>
    %82 = tpu.matmul %80, %81, %cst_31 {dimension_numbers = #tpu.dot_dimension_numbers<[1], [1], [0], [0], [0, 0, 1, 0], [], []>} : vector<8x4xbf16>, vector<8x4xbf16>, vector<8x8xf32> -> vector<8x8xf32>
    %cst_32 = arith.constant dense<0xFF800000> : vector<8xf32>
    %83 = vector.multi_reduction <maximumf>, %82, %cst_32 [1] : vector<8x8xf32> to vector<8xf32>
    %84 = vector.shape_cast %83 : vector<8xf32> to vector<8x1xf32>
    %85 = vector.broadcast %84 : vector<8x1xf32> to vector<8x8xf32>
    %86 = arith.subf %82, %85 : vector<8x8xf32>
    %87 = math.exp %86 : vector<8x8xf32>
    %cst_33 = arith.constant dense<0.000000e+00> : vector<8xf32>
    %88 = vector.multi_reduction <add>, %87, %cst_33 [1] : vector<8x8xf32> to vector<8xf32>
    %89 = vector.shape_cast %88 : vector<8xf32> to vector<8x1xf32>
    %90 = arith.truncf %87 : vector<8x8xf32> to vector<8x8xbf16>
    %91 = vector.extract_strided_slice %28 {offsets = [0, 12], sizes = [8, 4], strides = [1, 1]} : vector<8x32xbf16> to vector<8x4xbf16>
    %cst_34 = arith.constant dense<0.000000e+00> : vector<8x4xf32>
    %92 = tpu.matmul %90, %91, %cst_34 {dimension_numbers = #tpu.dot_dimension_numbers<[1], [0], [0], [1], [0, 0, 1, 1], [], []>} : vector<8x8xbf16>, vector<8x4xbf16>, vector<8x4xf32> -> vector<8x4xf32>
    %93 = tpu.reciprocal %89 {approx = true} : vector<8x1xf32> -> vector<8x1xf32>
    %94 = vector.broadcast %93 : vector<8x1xf32> to vector<8x4xf32>
    %95 = arith.mulf %92, %94 : vector<8x4xf32>
    %c0_35 = arith.constant 0 : index
    %c12 = arith.constant 12 : index
    %96 = vector.load %arg8[%c0_35, %c12] : memref<8x32xf32, #tpu.memory_space<vmem>>, vector<8x4xf32>
    tpu.vector_store %arg8[%c0_35, %c12], %95 {strides = array<i32>} : memref<8x32xf32, #tpu.memory_space<vmem>>, vector<8x4xf32>,
    %97 = vector.extract_strided_slice %26 {offsets = [0, 16], sizes = [8, 4], strides = [1, 1]} : vector<8x32xbf16> to vector<8x4xbf16>
    %98 = vector.extract_strided_slice %27 {offsets = [0, 16], sizes = [8, 4], strides = [1, 1]} : vector<8x32xbf16> to vector<8x4xbf16>
    %cst_36 = arith.constant dense<0.000000e+00> : vector<8x8xf32>
    %99 = tpu.matmul %97, %98, %cst_36 {dimension_numbers = #tpu.dot_dimension_numbers<[1], [1], [0], [0], [0, 0, 1, 0], [], []>} : vector<8x4xbf16>, vector<8x4xbf16>, vector<8x8xf32> -> vector<8x8xf32>
    %cst_37 = arith.constant dense<0xFF800000> : vector<8xf32>
    %100 = vector.multi_reduction <maximumf>, %99, %cst_37 [1] : vector<8x8xf32> to vector<8xf32>
    %101 = vector.shape_cast %100 : vector<8xf32> to vector<8x1xf32>
    %102 = vector.broadcast %101 : vector<8x1xf32> to vector<8x8xf32>
    %103 = arith.subf %99, %102 : vector<8x8xf32>
    %104 = math.exp %103 : vector<8x8xf32>
    %cst_38 = arith.constant dense<0.000000e+00> : vector<8xf32>
    %105 = vector.multi_reduction <add>, %104, %cst_38 [1] : vector<8x8xf32> to vector<8xf32>
    %106 = vector.shape_cast %105 : vector<8xf32> to vector<8x1xf32>
    %107 = arith.truncf %104 : vector<8x8xf32> to vector<8x8xbf16>
    %108 = vector.extract_strided_slice %28 {offsets = [0, 16], sizes = [8, 4], strides = [1, 1]} : vector<8x32xbf16> to vector<8x4xbf16>
    %cst_39 = arith.constant dense<0.000000e+00> : vector<8x4xf32>
    %109 = tpu.matmul %107, %108, %cst_39 {dimension_numbers = #tpu.dot_dimension_numbers<[1], [0], [0], [1], [0, 0, 1, 1], [], []>} : vector<8x8xbf16>, vector<8x4xbf16>, vector<8x4xf32> -> vector<8x4xf32>
    %110 = tpu.reciprocal %106 {approx = true} : vector<8x1xf32> -> vector<8x1xf32>
    %111 = vector.broadcast %110 : vector<8x1xf32> to vector<8x4xf32>
    %112 = arith.mulf %109, %111 : vector<8x4xf32>
    %c0_40 = arith.constant 0 : index
    %c16 = arith.constant 16 : index
    %113 = vector.load %arg8[%c0_40, %c16] : memref<8x32xf32, #tpu.memory_space<vmem>>, vector<8x4xf32>
    tpu.vector_store %arg8[%c0_40, %c16], %112 {strides = array<i32>} : memref<8x32xf32, #tpu.memory_space<vmem>>, vector<8x4xf32>,
    %114 = vector.extract_strided_slice %26 {offsets = [0, 20], sizes = [8, 4], strides = [1, 1]} : vector<8x32xbf16> to vector<8x4xbf16>
    %115 = vector.extract_strided_slice %27 {offsets = [0, 20], sizes = [8, 4], strides = [1, 1]} : vector<8x32xbf16> to vector<8x4xbf16>
    %cst_41 = arith.constant dense<0.000000e+00> : vector<8x8xf32>
    %116 = tpu.matmul %114, %115, %cst_41 {dimension_numbers = #tpu.dot_dimension_numbers<[1], [1], [0], [0], [0, 0, 1, 0], [], []>} : vector<8x4xbf16>, vector<8x4xbf16>, vector<8x8xf32> -> vector<8x8xf32>
    %cst_42 = arith.constant dense<0xFF800000> : vector<8xf32>
    %117 = vector.multi_reduction <maximumf>, %116, %cst_42 [1] : vector<8x8xf32> to vector<8xf32>
    %118 = vector.shape_cast %117 : vector<8xf32> to vector<8x1xf32>
    %119 = vector.broadcast %118 : vector<8x1xf32> to vector<8x8xf32>
    %120 = arith.subf %116, %119 : vector<8x8xf32>
    %121 = math.exp %120 : vector<8x8xf32>
    %cst_43 = arith.constant dense<0.000000e+00> : vector<8xf32>
    %122 = vector.multi_reduction <add>, %121, %cst_43 [1] : vector<8x8xf32> to vector<8xf32>
    %123 = vector.shape_cast %122 : vector<8xf32> to vector<8x1xf32>
    %124 = arith.truncf %121 : vector<8x8xf32> to vector<8x8xbf16>
    %125 = vector.extract_strided_slice %28 {offsets = [0, 20], sizes = [8, 4], strides = [1, 1]} : vector<8x32xbf16> to vector<8x4xbf16>
    %cst_44 = arith.constant dense<0.000000e+00> : vector<8x4xf32>
    %126 = tpu.matmul %124, %125, %cst_44 {dimension_numbers = #tpu.dot_dimension_numbers<[1], [0], [0], [1], [0, 0, 1, 1], [], []>} : vector<8x8xbf16>, vector<8x4xbf16>, vector<8x4xf32> -> vector<8x4xf32>
    %127 = tpu.reciprocal %123 {approx = true} : vector<8x1xf32> -> vector<8x1xf32>
    %128 = vector.broadcast %127 : vector<8x1xf32> to vector<8x4xf32>
    %129 = arith.mulf %126, %128 : vector<8x4xf32>
    %c0_45 = arith.constant 0 : index
    %c20 = arith.constant 20 : index
    %130 = vector.load %arg8[%c0_45, %c20] : memref<8x32xf32, #tpu.memory_space<vmem>>, vector<8x4xf32>
    tpu.vector_store %arg8[%c0_45, %c20], %129 {strides = array<i32>} : memref<8x32xf32, #tpu.memory_space<vmem>>, vector<8x4xf32>,
    %131 = vector.extract_strided_slice %26 {offsets = [0, 24], sizes = [8, 4], strides = [1, 1]} : vector<8x32xbf16> to vector<8x4xbf16>
    %132 = vector.extract_strided_slice %27 {offsets = [0, 24], sizes = [8, 4], strides = [1, 1]} : vector<8x32xbf16> to vector<8x4xbf16>
    %cst_46 = arith.constant dense<0.000000e+00> : vector<8x8xf32>
    %133 = tpu.matmul %131, %132, %cst_46 {dimension_numbers = #tpu.dot_dimension_numbers<[1], [1], [0], [0], [0, 0, 1, 0], [], []>} : vector<8x4xbf16>, vector<8x4xbf16>, vector<8x8xf32> -> vector<8x8xf32>
    %cst_47 = arith.constant dense<0xFF800000> : vector<8xf32>
    %134 = vector.multi_reduction <maximumf>, %133, %cst_47 [1] : vector<8x8xf32> to vector<8xf32>
    %135 = vector.shape_cast %134 : vector<8xf32> to vector<8x1xf32>
    %136 = vector.broadcast %135 : vector<8x1xf32> to vector<8x8xf32>
    %137 = arith.subf %133, %136 : vector<8x8xf32>
    %138 = math.exp %137 : vector<8x8xf32>
    %cst_48 = arith.constant dense<0.000000e+00> : vector<8xf32>
    %139 = vector.multi_reduction <add>, %138, %cst_48 [1] : vector<8x8xf32> to vector<8xf32>
    %140 = vector.shape_cast %139 : vector<8xf32> to vector<8x1xf32>
    %141 = arith.truncf %138 : vector<8x8xf32> to vector<8x8xbf16>
    %142 = vector.extract_strided_slice %28 {offsets = [0, 24], sizes = [8, 4], strides = [1, 1]} : vector<8x32xbf16> to vector<8x4xbf16>
    %cst_49 = arith.constant dense<0.000000e+00> : vector<8x4xf32>
    %143 = tpu.matmul %141, %142, %cst_49 {dimension_numbers = #tpu.dot_dimension_numbers<[1], [0], [0], [1], [0, 0, 1, 1], [], []>} : vector<8x8xbf16>, vector<8x4xbf16>, vector<8x4xf32> -> vector<8x4xf32>
    %144 = tpu.reciprocal %140 {approx = true} : vector<8x1xf32> -> vector<8x1xf32>
    %145 = vector.broadcast %144 : vector<8x1xf32> to vector<8x4xf32>
    %146 = arith.mulf %143, %145 : vector<8x4xf32>
    %c0_50 = arith.constant 0 : index
    %c24 = arith.constant 24 : index
    %147 = vector.load %arg8[%c0_50, %c24] : memref<8x32xf32, #tpu.memory_space<vmem>>, vector<8x4xf32>
    tpu.vector_store %arg8[%c0_50, %c24], %146 {strides = array<i32>} : memref<8x32xf32, #tpu.memory_space<vmem>>, vector<8x4xf32>,
    %148 = vector.extract_strided_slice %26 {offsets = [0, 28], sizes = [8, 4], strides = [1, 1]} : vector<8x32xbf16> to vector<8x4xbf16>
    %149 = vector.extract_strided_slice %27 {offsets = [0, 28], sizes = [8, 4], strides = [1, 1]} : vector<8x32xbf16> to vector<8x4xbf16>
    %cst_51 = arith.constant dense<0.000000e+00> : vector<8x8xf32>
    %150 = tpu.matmul %148, %149, %cst_51 {dimension_numbers = #tpu.dot_dimension_numbers<[1], [1], [0], [0], [0, 0, 1, 0], [], []>} : vector<8x4xbf16>, vector<8x4xbf16>, vector<8x8xf32> -> vector<8x8xf32>
    %cst_52 = arith.constant dense<0xFF800000> : vector<8xf32>
    %151 = vector.multi_reduction <maximumf>, %150, %cst_52 [1] : vector<8x8xf32> to vector<8xf32>
    %152 = vector.shape_cast %151 : vector<8xf32> to vector<8x1xf32>
    %153 = vector.broadcast %152 : vector<8x1xf32> to vector<8x8xf32>
    %154 = arith.subf %150, %153 : vector<8x8xf32>
    %155 = math.exp %154 : vector<8x8xf32>
    %cst_53 = arith.constant dense<0.000000e+00> : vector<8xf32>
    %156 = vector.multi_reduction <add>, %155, %cst_53 [1] : vector<8x8xf32> to vector<8xf32>
    %157 = vector.shape_cast %156 : vector<8xf32> to vector<8x1xf32>
    %158 = arith.truncf %155 : vector<8x8xf32> to vector<8x8xbf16>
    %159 = vector.extract_strided_slice %28 {offsets = [0, 28], sizes = [8, 4], strides = [1, 1]} : vector<8x32xbf16> to vector<8x4xbf16>
    %cst_54 = arith.constant dense<0.000000e+00> : vector<8x4xf32>
    %160 = tpu.matmul %158, %159, %cst_54 {dimension_numbers = #tpu.dot_dimension_numbers<[1], [0], [0], [1], [0, 0, 1, 1], [], []>} : vector<8x8xbf16>, vector<8x4xbf16>, vector<8x4xf32> -> vector<8x4xf32>
    %161 = tpu.reciprocal %157 {approx = true} : vector<8x1xf32> -> vector<8x1xf32>
    %162 = vector.broadcast %161 : vector<8x1xf32> to vector<8x4xf32>
    %163 = arith.mulf %160, %162 : vector<8x4xf32>
    %c0_55 = arith.constant 0 : index
    %c28 = arith.constant 28 : index
    %164 = vector.load %arg8[%c0_55, %c28] : memref<8x32xf32, #tpu.memory_space<vmem>>, vector<8x4xf32>
    tpu.vector_store %arg8[%c0_55, %c28], %163 {strides = array<i32>} : memref<8x32xf32, #tpu.memory_space<vmem>>, vector<8x4xf32>,
    %c0_56 = arith.constant 0 : index
    %c0_57 = arith.constant 0 : index
    %165 = vector.load %arg8[%c0_56, %c0_57] : memref<8x32xf32, #tpu.memory_space<vmem>>, vector<8x32xf32>
    %166 = arith.truncf %165 : vector<8x32xf32> to vector<8x32xbf16>
    %c0_58 = arith.constant 0 : index
    %c0_59 = arith.constant 0 : index
    %167 = vector.load %arg4[%c0_58, %c0_59] : memref<32x32xbf16, #tpu.memory_space<vmem>>, vector<32x32xbf16>
    %cst_60 = arith.constant dense<0.000000e+00> : vector<8x32xf32>
    %168 = tpu.matmul %166, %167, %cst_60 {dimension_numbers = #tpu.dot_dimension_numbers<[1], [0], [0], [1], [0, 0, 1, 1], [], []>} : vector<8x32xbf16>, vector<32x32xbf16>, vector<8x32xf32> -> vector<8x32xf32>
    %c0_61 = arith.constant 0 : index
    %c0_62 = arith.constant 0 : index
    %169 = vector.load %arg5[%c0_61, %c0_62] : memref<1x32xf32, #tpu.memory_space<vmem>>, vector<1x32xf32>
    %170 = vector.broadcast %169 : vector<1x32xf32> to vector<8x32xf32>
    %171 = arith.addf %168, %170 : vector<8x32xf32>
    %c0_63 = arith.constant 0 : index
    %c0_64 = arith.constant 0 : index
    %c0_65 = arith.constant 0 : index
    %172 = vector.load %arg7[%c0_63, %c0_64, %c0_65] : memref<1x8x32xf32, #tpu.memory_space<vmem>>, vector<1x8x32xf32>
    %173 = vector.shape_cast %172 : vector<1x8x32xf32> to vector<8x32xf32>
    %174 = vector.shape_cast %171 : vector<8x32xf32> to vector<1x8x32xf32>
    tpu.vector_store %arg7[%c0_63, %c0_64, %c0_65], %174 {strides = array<i32>} : memref<1x8x32xf32, #tpu.memory_space<vmem>>, vector<1x8x32xf32>,
    return
  }
  func.func @transform_0(%arg0: i32) -> (i32, i32, i32) {
    %c0_i32 = arith.constant 0 : i32
    %c0_i32_0 = arith.constant 0 : i32
    %c0_i32_1 = arith.constant 0 : i32
    return %arg0, %c0_i32, %c0_i32_0 : i32, i32, i32
  }
  func.func @transform_1(%arg0: i32) -> (i32, i32) {
    %c0_i32 = arith.constant 0 : i32
    %c0_i32_0 = arith.constant 0 : i32
    %c0_i32_1 = arith.constant 0 : i32
    return %c0_i32, %c0_i32_0 : i32, i32
  }
  func.func @transform_2(%arg0: i32) -> (i32, i32) {
    %c0_i32 = arith.constant 0 : i32
    %c0_i32_0 = arith.constant 0 : i32
    %c0_i32_1 = arith.constant 0 : i32
    return %c0_i32, %c0_i32_0 : i32, i32
  }
  func.func @transform_3(%arg0: i32) -> (i32, i32) {
    %c0_i32 = arith.constant 0 : i32
    %c0_i32_0 = arith.constant 0 : i32
    %c0_i32_1 = arith.constant 0 : i32
    return %c0_i32, %c0_i32_0 : i32, i32
  }
  func.func @transform_4(%arg0: i32) -> (i32, i32) {
    %c0_i32 = arith.constant 0 : i32
    %c0_i32_0 = arith.constant 0 : i32
    %c0_i32_1 = arith.constant 0 : i32
    return %c0_i32, %c0_i32_0 : i32, i32
  }
  func.func @transform_5(%arg0: i32) -> (i32, i32, i32) {
    %c0_i32 = arith.constant 0 : i32
    %c0_i32_0 = arith.constant 0 : i32
    %c0_i32_1 = arith.constant 0 : i32
    %c0_i32_2 = arith.constant 0 : i32
    return %c0_i32, %c0_i32_0, %c0_i32_1 : i32, i32, i32
  }
  func.func @transform_6(%arg0: i32) -> (i32, i32, i32) {
    %c0_i32 = arith.constant 0 : i32
    %c0_i32_0 = arith.constant 0 : i32
    %c0_i32_1 = arith.constant 0 : i32
    return %arg0, %c0_i32, %c0_i32_0 : i32, i32, i32
  }
}

</mosaic_0001>

<bundles_post_ra>
// kernel: tpu_custom_call.1
= control target key start
LH: loop header
LB: loop body
LE: loop exit
PB: predicated region body
PF: predicated region fallthrough
CT: control target
= control target key end

     0   :  { %s2553_s0 = inlined_call_operand.hbm [shape: bf16[2,8,32], index: 0, kind: input, shape index: {}]   ;;  %s2554_s1 = inlined_call_operand.hbm [shape: bf16[32,160], index: 1, kind: input, shape index: {}]   ;;  %s2555_s2 = inlined_call_operand.vmem [shape: f32[1,160], index: 2, kind: input, shape index: {}]   ;;  %s2556_s3 = inlined_call_operand.hbm [shape: bf16[32,32], index: 3, kind: input, shape index: {}]   ;;  %s2557_s4 = inlined_call_operand.vmem [shape: f32[1,32], index: 4, kind: input, shape index: {}]   ;;  %s2558_s5 = inlined_call_operand.hbm [shape: f32[4,8,32], index: 5, kind: input, shape index: {}]   ;;  %s2559_s6 = inlined_call_operand.hbm [shape: f32[2,8,32], index: 6, kind: output, shape index: {}]  }
   0x1   :  { %2565 = sst [smem:[#allocation16_spill]] %s2554_s1 }
   0x2   :  { %11 = vsyncpa [#allocation4], 0 }
   0x3   :  { %13 = vsyncpa [#allocation4 + $0x1], 0 }
   0x4   :  { %14 = vsyncpa [#allocation7], 0 }
   0x5   :  { %15 = vsyncpa [#allocation10], 0 }
   0x6   :  { %16 = vsyncpa [#allocation5], 0 }
   0x7   :  { %18 = vsyncpa [#allocation5 + $0x1], 0  ;;  %s2140_s21 = smov 0   ;;  %s2142_s22 = smov 0  }
   0x8   :  { %s2144_s23 = smov 0   ;;  %s2146_s24 = smov 0  }
   0x9 LB: > { %s2161_s25 = sadd.s32 4294967295, %s2060_s24   ;;  %s1535_s26 = sadd.s32 4294967294, %s2060_s24   ;;  %s2060_s24 = sphi %s2146_s24, %s2588_s24   ;;  %s2056_s23 = sphi %s2144_s23, %s2587_s23   ;;  %s2052_s22 = sphi %s2142_s22, %s2586_s22   ;;  %s2048_s21 = sphi %s2140_s21, %s2585_s21  }
   0xa   : > { %p44_p0 = scmp.ne.s32.totalorder %s2052_s22, %s2048_s21  ;;  %p2560_p1 = scmp.eq.s32.totalorder %s2161_s25, 0 }
   0xb   : > { %p179_p3 = scmp.eq.s32.totalorder %s1535_s26, 1  ;;  %p1536_p5 = scmp.ge.s32.totalorder %s2060_s24, 1 }
   0xc   : > { %p2170_p4 = por %p2560_p1, %p44_p0  ;;  %p186_p7 = scmp.lt.s32.totalorder %s2060_s24, 3 }
   0xd   : > { %p2175_p6 = por %p179_p3, %p44_p0  ;;  %s2062_s30 = smov [#allocation6]  }
   0xe   : > { %s2566_s27 = scalar_select %p2170_p4, 1, 0 }
   0xf   : > { %s2567_s28 = scalar_select %p2175_p6, 1, 0 }
  0x10   : > { %p2180_p8 = pnand %p1536_p5, %p186_p7  ;;  %s198_s7 = sshll.u32 %s2062_s30, 4  ;;  %s2184_s7 = int_to_ptr.vmem [resolvable:$true] %s198_s7 }
  0x11   : > { %s2063_s9 = smov [#allocation8]   ;;  %s2570_s1 = sld [smem:[#allocation16_spill]] }
  0x12   : > { %s2568_s29 = scalar_select %p2180_p8, 1, 0 }
  0x13   : > { %p1733_p9 = pneg %p2180_p8  ;;  %s214_s10 = sshll.u32 %s2063_s9, 4  ;;  %s2195_s10 = int_to_ptr.vmem [resolvable:$true] %s214_s10 }
  0x15   : > { %p2191_p11 = pnand %p1733_p9, %p2560_p1 }
  0x17   : > { %s1872_s13 = scalar_lea.hbm %s2570_s1, 512  ;;  %p2205_p13 = pneg %p2191_p11 }
  0x18   : > { %p1873_p12 = scmp.ne.s32.totalorder %s2570_s1, %s1872_s13  ;;  %p1879_p5 = scmp.lt.u32.totalorder %s1872_s13, %s2570_s1 }
  0x1a   : > { %p1875_p0 = pnand %p2205_p13, %p1873_p12 }
  0x1c   : > { %p1876_p3 = pneg %p1875_p0 }
  0x1e   : > { %p1881_p7 = pnand %p1879_p5, %p1876_p3 }
  0x20   : > { %1884 = shalt.err (!%p1881_p7)
}
  0x21   : > { %s1885_s19 = scalar_lea.vmem %s2184_s7, 512  ;;  %p1893_p2 = scmp.lt.s32.totalorder %s2184_s7, %s2184_s7 }
  0x22   : > { %p1886_p9 = scmp.ne.s32.totalorder %s2184_s7, %s1885_s19  ;;  %p1894_p6 = scmp.lt.s32.totalorder %s1885_s19, %s1885_s19 }
  0x24   : > { %p1888_p10 = pnand %p1886_p9, %p2205_p13  ;;  %p1895_p12 = por %p1894_p6, %p1893_p2 }
  0x26   : > { %p1889_p1 = pneg %p1888_p10 }
  0x28   : > { %p1896_p0 = pnand %p1895_p12, %p1889_p1 }
  0x2a   : > { %1899 = shalt.err (!%p1896_p0)
}
  0x2b   : > { %s2561_s20 = smov 128   ;;  %s2562_s26 = smov 8  }
  0x2c   : > { %1736 = dma.hbm_to_vmem [thread:$0]  (!%p2191_p11), %s2570_s1, 512, %s2184_s7, [#allocation7], %s2561_s20, %s2561_s20, %s2562_s26  }
  0x2d   : > { %s1900_s13 = scalar_lea.hbm %s2556_s3, 256 }
  0x2e   : > { %p1901_p1 = scmp.ne.s32.totalorder %s2556_s3, %s1900_s13  ;;  %p1907_p10 = scmp.lt.u32.totalorder %s1900_s13, %s2556_s3 }
  0x30   : > { %p1903_p2 = pnand %p1901_p1, %p2205_p13 }
  0x32   : > { %p1904_p6 = pneg %p1903_p2 }
  0x34   : > { %p1909_p3 = pnand %p1907_p10, %p1904_p6 }
  0x36   : > { %1912 = shalt.err (!%p1909_p3)
}
  0x37   : > { %s1913_s7 = scalar_lea.vmem %s2195_s10, 256  ;;  %p1921_p12 = scmp.lt.s32.totalorder %s2195_s10, %s2195_s10 }
  0x38   : > { %p1914_p5 = scmp.ne.s32.totalorder %s2195_s10, %s1913_s7  ;;  %p1922_p0 = scmp.lt.s32.totalorder %s1913_s7, %s1913_s7 }
  0x3a   : > { %p1916_p7 = pnand %p1914_p5, %p2205_p13  ;;  %p1923_p1 = por %p1922_p0, %p1921_p12 }
  0x3c   : > { %p1917_p9 = pneg %p1916_p7 }
  0x3e   : > { %p1924_p2 = pnand %p1923_p1, %p1917_p9 }
  0x40   : > { %1927 = shalt.err (!%p1924_p2)
}
  0x41   : > { %s2066_s19 = smov 64   ;;  %s2067_s30 = smov 4  }
  0x42   : > { %1739 = dma.hbm_to_vmem [thread:$0]  (!%p2191_p11), %s2556_s3, 256, %s2195_s10, [#allocation7], %s2066_s19, %s2066_s19, %s2067_s30  }
  0x43   : > { %s2068_s12 = smov [#allocation9]   ;;  %s2253_s14 = sadd.s32 1, %s2060_s24  }
  0x44   : > { %s230_s13 = sshll.u32 %s2068_s12, 4  ;;  %s1928_s18 = scalar_lea.hbm %s2558_s5, 512  ;;  %s231_s13 = int_to_ptr.vmem [resolvable:$true] %s230_s13 }
  0x45   : > { %p1929_p6 = scmp.ne.s32.totalorder %s2558_s5, %s1928_s18  ;;  %p1935_p5 = scmp.lt.u32.totalorder %s1928_s18, %s2558_s5 }
  0x47   : > { %p1931_p10 = pnand %p1929_p6, %p2205_p13 }
  0x49   : > { %p1932_p3 = pneg %p1931_p10 }
  0x4b   : > { %p1937_p7 = pnand %p1935_p5, %p1932_p3 }
  0x4d   : > { %1940 = shalt.err (!%p1937_p7)
}
  0x4e   : > { %s1941_s10 = scalar_lea.vmem %s231_s13, 512  ;;  %p1949_p1 = scmp.lt.s32.totalorder %s231_s13, %s231_s13 }
  0x4f   : > { %p1942_p9 = scmp.ne.s32.totalorder %s231_s13, %s1941_s10  ;;  %p1950_p2 = scmp.lt.s32.totalorder %s1941_s10, %s1941_s10 }
  0x51   : > { %p1944_p12 = pnand %p1942_p9, %p2205_p13  ;;  %p1951_p4 = por %p1950_p2, %p1949_p1 }
  0x53   : > { %p1945_p0 = pneg %p1944_p12 }
  0x55   : > { %p1952_p8 = pnand %p1951_p4, %p1945_p0 }
  0x57   : > { %1955 = shalt.err (!%p1952_p8)
}
  0x58   : > { %s2572_s20 = smov 8   ;;  %s2573_s19 = smov 128  }
  0x59   : > { %1742 = dma.hbm_to_vmem [thread:$0]  (!%p2191_p11), %s2558_s5, 512, %s231_s13, [#allocation10], %s2573_s19, %s2573_s19, %s2572_s20  }
  0x5a   : > { %s28_s16 = ssub.s32 %s2060_s24, %s2253_s14  ;;  %s31_s8 = sadd.s32 1, %s2056_s23 }
  0x5b   : > { %p29_p4 = scmp.eq.s32.totalorder %s28_s16, 0  ;;  %p38_p8 = scmp.ne.s32.totalorder %s2056_s23, %s2052_s22 }
  0x5c   : > { %p39_p13 = scmp.eq.s32.totalorder %s2060_s24, 0  ;;  %p1754_p6 = scmp.lt.s32.totalorder %s2060_s24, 2 }
  0x5d   : > { %s2284_s30 = scalar_select %p29_p4, %s2056_s23, %s31_s8  }
  0x5e   : > { %p40_p10 = por %p39_p13, %p38_p8  ;;  %p2574_p3 = scmp.eq.s32.totalorder %s2161_s25, 1 }
  0x5f   : > { %s244_s11 = sand.u32 1, %s2056_s23   ;;  %s1542_s12 = sshll.u32 %s2060_s24, 6 }
  0x60   : > { %p2288_p5 = por %p2574_p3, %p38_p8  ;;  %s1541_s15 = sshll.u32 %s244_s11, 2 }
  0x61   : > { %s2297_s13 = scalar_lea.hbm %s2553_s0, %s1542_s12  ;;  %s248_s7 = scalar_lea.vmem [#allocation3], %s1541_s15 }
  0x62   : > { %s255_s10 = sshll.u32 %s248_s7, 4  ;;  %p2299_p11 = pnand %p1754_p6, %p40_p10  ;;  %s2303_s10 = int_to_ptr.vmem [resolvable:$true] %s255_s10 }
  0x63   : > { %s245_s19 = scalar_lea.sflag [#allocation4], %s244_s11  ;;  %s1956_s1 = scalar_lea.hbm %s2297_s13, 64 }
  0x64   : > { %p1957_p7 = scmp.ne.s32.totalorder %s2297_s13, %s1956_s1  ;;  %p1958_p9 = pneg %p2299_p11 }
  0x65   : > { %s1961_s8 = scalar_lea.hbm %s2553_s0, 128  ;;  %p1962_p1 = scmp.lt.u32.totalorder %s2297_s13, %s2553_s0 }
  0x66   : > { %p1959_p12 = pnand %p1958_p9, %p1957_p7  ;;  %p1963_p2 = scmp.lt.u32.totalorder %s1961_s8, %s1956_s1 }
  0x67   : > { %p1965_p8 = scmp.lt.u32.totalorder %s1956_s1, %s2297_s13 }
  0x68   : > { %p1960_p0 = pneg %p1959_p12  ;;  %p1964_p4 = por %p1963_p2, %p1962_p1 }
  0x6a   : > { %p1966_p13 = por %p1965_p8, %p1964_p4 }
  0x6c   : > { %p1967_p6 = pnand %p1966_p13, %p1960_p0 }
  0x6e   : > { %1970 = shalt.err (!%p1967_p6)
}
  0x6f   : > { %s1971_s11 = scalar_lea.vmem %s2303_s10, 64  ;;  %s2069_s17 = smov [#allocation3]  }
  0x70   : > { %p1972_p10 = scmp.ne.s32.totalorder %s2303_s10, %s1971_s11  ;;  %s1976_s18 = sshll.u32 %s2069_s17, 4  ;;  %s1977_s18 = int_to_ptr.vmem [resolvable:$false] %s1976_s18 }
  0x71   : > { %s1978_s7 = scalar_lea.vmem %s1977_s18, 128  ;;  %p1979_p12 = scmp.lt.s32.totalorder %s2303_s10, %s1977_s18 }
  0x72   : > { %p1974_p3 = pnand %p1972_p10, %p1958_p9  ;;  %p1980_p1 = scmp.lt.s32.totalorder %s1978_s7, %s1971_s11 }
  0x74   : > { %p1975_p7 = pneg %p1974_p3  ;;  %p1981_p2 = por %p1980_p1, %p1979_p12 }
  0x76   : > { %p1982_p4 = pnand %p1981_p2, %p1975_p7 }
  0x78   : > { %1985 = shalt.err (!%p1982_p4)
}
  0x79   : > { %1746 = dma.hbm_to_vmem [thread:$0]  (!%p2299_p11), %s2297_s13, 64, %s2303_s10, %s245_s19  }
  0x7a   : > { %p2577_p0 = scmp.ne.s32.totalorder %s2568_s29, 0 }
  0x7b   : > { %s2333_s1 = sand.u32 (!%p2577_p0), 1, %s2052_s22   ;;  %p2578_p9 = scmp.ne.s32.totalorder (!%p2577_p0), %s2566_s27, 0 }
  0x7c   : > { %264 = sbr.rel (%p2577_p0) target bundleno = 1630 (0x65e), region = 44  ;;  %s1544_s26 = sshll.u32 (!%p2577_p0), %s2333_s1, 2 }
  0x7d   : > { %s267_s16 = scalar_lea.sflag (!%p2577_p0), [#allocation4], %s2333_s1  ;;  %s270_s8 = scalar_lea.vmem (!%p2577_p0), [#allocation3], %s1544_s26 }
  0x83   : > { %2031 = dma.done.wait (%p2578_p9), %s267_s16, 64  }
  0x84   : > { %2033 = vsyncadd (%p2578_p9), %s267_s16, 4294967232  ;;  %p2579_p8 = scmp.eq.s32.totalorder %s2161_s25, 0 }
  0x86   : > { %2035 = dma.done.wait (%p2579_p8), [#allocation7], 768   ;;  %p2580_p11 = pmov %p2579_p8 }
  0x87   : > { %p2581_p13 = pmov %p2579_p8 }
  0x88   : > { %2037 = vsyncadd (%p2580_p11), [#allocation7], 4294966528 }
  0x89   : > { %2039 = dma.done.wait (%p2581_p13), [#allocation10], 512   ;;  %p2582_p6 = pmov %p2579_p8 }
  0x8a   : > { %v2070_v0 = vmov 0   ;;  %v1832_v1 = vld [vmem:[#allocation6 + $0x4] ss:$8 sps:$4 sm:$0xff]   ;;  %v1834_v2 = vld [vmem:[#allocation6] ss:$8 sps:$4 sm:$0xff]   ;;  %v397_v5 = vld [vmem:[#allocation9 + $0x8] sm:$0xff]  ;;  %v319_v8 = vlaneseq }
  0x8b   : > { %2041 = vsyncadd (%p2582_p6), [#allocation10], 4294966784  ;;  %385 = vmatprep.mubr.bf16.mxu0 %v2070_v0  ;;  %353 = vmatprep.subr.bf16.mxu0 %v1832_v1  ;;  %v1835_v3 = vld [vmem:[#allocation6 + $0x14] ss:$8 sps:$4 sm:$0xff]   ;;  %v1837_v4 = vld [vmem:[#allocation6 + $0x10] ss:$8 sps:$4 sm:$0xff]  }
  0x8c   : > { %354 = vmatpush1.bf16.msra.mxu0 %v1834_v2  ;;  %s2071_s27 = smov 96   ;;  %v409_v6 = vld [vmem:[#allocation9 + $0x10] sm:$0xff]  ;;  %v312_v7 = vld [vmem:[%s270_s8] sm:$0xf]  ;;  %vm349_vm0 = vcmask 261120   ;;  %s2072_s29 = smov 32  }
  0x8d   : > { %355 = vmatprep.subr.bf16.mxu0 %v1835_v3  ;;  %399 = vrot.lane.b32.xlu0 %v397_v5, %s2071_s27  ;;  %v320_v9 = vshrl.u32 %v319_v8, 7  ;;  %v317_v11 = vld [vmem:[%s2555_s2] sm:$0x3]  ;;  %v416_v17 = vld [vmem:[#allocation9 + $0x18] sm:$0xff]  ;;  %v2073_v25 = vmov 0.0   ;;  %vm2074_vm1 = vmmov 0  }
  0x8e   : > { %1613 = vmatprep.subr.bf16.mxu1 %v2073_v25  ;;  %1615 = vmatprep.mubr.msk.bf16.mxu1 %vm2074_vm1, %v2073_v25  ;;  %v394_v29 = vld [vmem:[#allocation9] sm:$0xff]  ;;  %s2075_s20 = smov 92   ;;  %s2076_s19 = smov 88   ;;  %vm429_vm2 = vcmask 31744   ;;  %vm493_vm3 = vcmask 1043456   ;;  %vm476_vm4 = vcmask 64512  }
  0x8f   : > { %v325_v10 = vsub.s32 1, %v320_v9  ;;  %v321_v12 = vsub.s32 0, %v320_v9  ;;  %s2077_s12 = smov 124   ;;  %s2078_s15 = smov 84   ;;  %vm655_vm5 = vcmask 64544   ;;  %vm771_vm6 = vcmask 97344  }
  0x90   : > { %356 = vmatpush1.bf16.msra.mxu0 %v1837_v4  ;;  %s2079_s11 = smov 120   ;;  %s2080_s17 = smov 80   ;;  %vm887_vm7 = vcmask 130144   ;;  %vm1003_vm8 = vcmask 162944   ;;  %vm1119_vm9 = vcmask 195744   ;;  %vm1235_vm10 = vcmask 228544  }
  0x91   : > { %411 = vrot.lane.b32.xlu0 %v409_v6, %s2072_s29  ;;  %v326_v13 = vrot.slane %v317_v11, %v325_v10  ;;  %v322_v14 = vrot.slane %v317_v11, %v321_v12  ;;  %1619 = vmatprep.subr.bf16.mxu0 %v2073_v25  ;;  %s2081_s18 = smov 116   ;;  %s2082_s7 = smov 76   ;;  %vm1351_vm11 = vcmask 261344  }
  0x92   : > { %s2083_s26 = smov 112   ;;  %s2084_s16 = smov 72  }
  0x93   : > { %1553 = vmatmul.mubr.msk.bf16.vlgmr.msra.gmra.mrb[0].mxu0 %vm349_vm0, %v312_v7  ;;  %s2085_s8 = smov 108   ;;  %s2088_s13 = smov 60  }
  0x94   : > { %1621 = vmatprep.mubr.msk.bf16.mxu0 %vm2074_vm1, %v2073_v25  ;;  %s2089_s10 = smov 100  }
  0xff   : > { %v400_v23 = vpop.permute.xlu0 %399 }
 0x103   : > { %v412_v26 = vpop.permute.xlu0 %411 }
 0x166   : > { %v387_v15 = vpop.f32.mrb[0].mxu0 }
 0x167   : > { %v389_v16 = vpop.f32.mrb[1].mxu0  ;;  %v388_v21 = vadd.f32 %v387_v15, %v322_v14 }
 0x168   : > { %v390_v18 = vadd.f32 %v389_v16, %v326_v13  ;;  %v391_v19 = vpop.f32.mrb[2].mxu0 }
 0x169   : > { %v392_v20 = vpop.f32.mrb[3].mxu0  ;;  %v402_v24 = vmul.f32 %v400_v23, %v388_v21  ;;  %v414_v27 = vmul.f32 %v412_v26, %v388_v21  ;;  %v395_v32 = vmul.f32 %v394_v29, %v388_v21  ;;  %v2361_v36 = vpack.c.bf16 %v388_v21, %v388_v21 }
 0x16a   : > { %v417_v22 = vmul.f32 %v416_v17, %v390_v18 }
 0x16c   : > { %419 = vrot.lane.b32.xlu1 %v417_v22, %s2072_s29 }
 0x170   : > { %404 = vrot.lane.b32.xlu1 %v402_v24, %s2072_s29  ;;  %s2087_s29 = smov 104  }
 0x1de   : > { %v420_v28 = vpop.permute.xlu1 %419 }
 0x1df   : > { %v422_v30 = vadd.f32 %v420_v28, %v414_v27 }
 0x1e1   : > { %v424_v31 = vpack.c.bf16 %v422_v30, %v422_v30 }
 0x1e2   : > { %v405_v33 = vpop.permute.xlu1 %404 }
 0x1e3   : > { %v407_v34 = vadd.f32 %v405_v33, %v395_v32  ;;  %427 = vrot.lane.b32.xlu0 %v424_v31, %s2071_s27  ;;  %543 = vrot.lane.b32.xlu1 %v424_v31, %s2075_s20  ;;  %s2086_s27 = smov 68   ;;  %s2090_s20 = smov 64  }
 0x1e5   : > { %v423_v35 = vpack.c.bf16 %v407_v34, %v407_v34 }
 0x1e7   : > { %659 = vrot.lane.b32.xlu1 %v424_v31, %s2076_s19  ;;  %541 = vrot.lane.b32.xlu0 %v423_v35, %s2077_s12  ;;  %s2091_s19 = smov 56   ;;  %s2092_s12 = smov 52  }
 0x1eb   : > { %775 = vrot.lane.b32.xlu1 %v424_v31, %s2078_s15  ;;  %657 = vrot.lane.b32.xlu0 %v423_v35, %s2079_s11  ;;  %s2093_s15 = smov 48   ;;  %s2094_s11 = smov 44  }
 0x1ef   : > { %891 = vrot.lane.b32.xlu1 %v424_v31, %s2080_s17  ;;  %773 = vrot.lane.b32.xlu0 %v423_v35, %s2081_s18  ;;  %s2095_s17 = smov 40   ;;  %s2096_s18 = smov 36  }
 0x1f3   : > { %1007 = vrot.lane.b32.xlu1 %v424_v31, %s2082_s7  ;;  %889 = vrot.lane.b32.xlu0 %v423_v35, %s2083_s26  ;;  %s2097_s7 = smov 4   ;;  %s2098_s26 = smov 8  }
 0x1f7   : > { %1123 = vrot.lane.b32.xlu1 %v424_v31, %s2084_s16  ;;  %1005 = vrot.lane.b32.xlu0 %v423_v35, %s2085_s8  ;;  %s2099_s16 = smov 12   ;;  %s2100_s8 = smov 16  }
 0x1fb   : > { %1239 = vrot.lane.b32.xlu1 %v424_v31, %s2086_s27  ;;  %1121 = vrot.lane.b32.xlu0 %v423_v35, %s2087_s29  ;;  %s2101_s27 = smov 20   ;;  %s2102_s29 = smov 24  }
 0x1ff   : > { %601 = vrot.lane.b32.xlu1 %v2361_v36, %s2088_s13  ;;  %1237 = vrot.lane.b32.xlu0 %v423_v35, %s2089_s10  ;;  %s2103_s13 = smov 28   ;;  %s1548_s10 = sshll.u32 %s2333_s1, 3 }
 0x203   : > { %488 = vrot.lane.b32.xlu0 %v2361_v36, %s2090_s20 }
 0x255   : > { %v428_v37 = vpop.permute.xlu0 %427  ;;  %v544_v40 = vpop.permute.xlu1 %543 }
 0x256   : > { %v434_v38 = vsel %vm429_vm2, %v428_v37, 0  ;;  %v549_v42 = vsel %vm429_vm2, %v544_v40, 0 }
 0x257   : > { %1614 = vmatpush3.bf16.xpose.msra.mxu1 %v434_v38 }
 0x258   : > { %1625 = vmatprep.subr.bf16.mxu1 %v2073_v25 }
 0x259   : > { %v542_v39 = vpop.permute.xlu0 %541  ;;  %v660_v44 = vpop.permute.xlu1 %659 }
 0x25a   : > { %v665_v46 = vsel %vm429_vm2, %v660_v44, 0 }
 0x25d   : > { %v658_v41 = vpop.permute.xlu0 %657  ;;  %v776_v48 = vpop.permute.xlu1 %775 }
 0x25e   : > { %1616 = vmatmul.mubr.msk.bf16.vlgmr.msra.gmra.mrb[0].mxu1 %vm429_vm2, %v423_v35  ;;  %v781_v50 = vsel %vm429_vm2, %v776_v48, 0 }
 0x25f   : > { %1626 = vmatpush3.bf16.xpose.msra.mxu1 %v549_v42  ;;  %1627 = vmatprep.mubr.msk.bf16.mxu1 %vm2074_vm1, %v2073_v25 }
 0x260   : > { %1637 = vmatprep.subr.bf16.mxu1 %v2073_v25 }
 0x261   : > { %v774_v43 = vpop.permute.xlu0 %773  ;;  %v892_v52 = vpop.permute.xlu1 %891 }
 0x262   : > { %v897_v54 = vsel %vm429_vm2, %v892_v52, 0 }
 0x265   : > { %v890_v45 = vpop.permute.xlu0 %889  ;;  %v1008_v56 = vpop.permute.xlu1 %1007 }
 0x266   : > { %1628 = vmatmul.mubr.msk.bf16.vlgmr.msra.gmra.mrb[4].mxu1 %vm429_vm2, %v542_v39  ;;  %v1013_v57 = vsel %vm429_vm2, %v1008_v56, 0 }
 0x267   : > { %1638 = vmatpush3.bf16.xpose.msra.mxu1 %v665_v46  ;;  %1639 = vmatprep.mubr.msk.bf16.mxu1 %vm2074_vm1, %v2073_v25 }
 0x268   : > { %1649 = vmatprep.subr.bf16.mxu1 %v2073_v25 }
 0x269   : > { %v1006_v47 = vpop.permute.xlu0 %1005  ;;  %v1124_v58 = vpop.permute.xlu1 %1123 }
 0x26a   : > { %v1129_v59 = vsel %vm429_vm2, %v1124_v58, 0 }
 0x26d   : > { %v1122_v49 = vpop.permute.xlu0 %1121  ;;  %v1240_v60 = vpop.permute.xlu1 %1239 }
 0x26e   : > { %1640 = vmatmul.mubr.msk.bf16.vlgmr.msra.gmra.mrb[8].mxu1 %vm429_vm2, %v658_v41  ;;  %v1245_v61 = vsel %vm429_vm2, %v1240_v60, 0 }
 0x26f   : > { %1650 = vmatpush3.bf16.xpose.msra.mxu1 %v781_v50  ;;  %1651 = vmatprep.mubr.msk.bf16.mxu1 %vm2074_vm1, %v2073_v25 }
 0x270   : > { %1661 = vmatprep.subr.bf16.mxu1 %v2073_v25 }
 0x271   : > { %v1238_v51 = vpop.permute.xlu0 %1237  ;;  %v602_v40 = vpop.permute.xlu1 %601 }
 0x275   : > { %v489_v53 = vpop.permute.xlu0 %488 }
 0x276   : > { %v495_v55 = vsel %vm493_vm3, %v489_v53, 0  ;;  %1652 = vmatmul.mubr.msk.bf16.vlgmr.msra.gmra.mrb[12].mxu1 %vm429_vm2, %v774_v43 }
 0x277   : > { %1620 = vmatpush3.bf16.msra.mxu0 %v495_v55  ;;  %1662 = vmatpush3.bf16.xpose.msra.mxu1 %v897_v54 }
 0x278   : > { %1663 = vmatprep.mubr.msk.bf16.mxu1 %vm2074_vm1, %v2073_v25  ;;  %1673 = vmatprep.subr.bf16.mxu1 %v2073_v25 }
 0x279   : > { %1631 = vmatprep.subr.bf16.mxu0 %v2073_v25 }
 0x27e   : > { %1664 = vmatmul.mubr.msk.bf16.vlgmr.msra.gmra.mrb[16].mxu1 %vm429_vm2, %v890_v45 }
 0x27f   : > { %1674 = vmatpush3.bf16.xpose.msra.mxu1 %v1013_v57  ;;  %1675 = vmatprep.mubr.msk.bf16.mxu1 %vm2074_vm1, %v2073_v25 }
 0x280   : > { %1685 = vmatprep.subr.bf16.mxu1 %v2073_v25 }
 0x286   : > { %1676 = vmatmul.mubr.msk.bf16.vlgmr.msra.gmra.mrb[20].mxu1 %vm429_vm2, %v1006_v47 }
 0x287   : > { %1686 = vmatpush3.bf16.xpose.msra.mxu1 %v1129_v59  ;;  %1687 = vmatprep.mubr.msk.bf16.mxu1 %vm2074_vm1, %v2073_v25 }
 0x288   : > { %1697 = vmatprep.subr.bf16.mxu1 %v2073_v25 }
 0x28e   : > { %1688 = vmatmul.mubr.msk.bf16.vlgmr.msra.gmra.mrb[24].mxu1 %vm429_vm2, %v1122_v49 }
 0x28f   : > { %1698 = vmatpush3.bf16.xpose.msra.mxu1 %v1245_v61  ;;  %1699 = vmatprep.mubr.msk.bf16.mxu1 %vm2074_vm1, %v2073_v25 }
 0x290   : > { %1709 = vmatprep.subr.bf16.mxu1 %v2073_v25 }
 0x296   : > { %1700 = vmatmul.mubr.msk.bf16.vlgmr.msra.gmra.mrb[28].mxu1 %vm429_vm2, %v1238_v51 }
 0x297   : > { %1713 = vmatprep.mubr.msk.bf16.mxu1 %vm2074_vm1, %v2073_v25 }
 0x331   : > { %v2407_v62 = vpop.f32.mrb[0].mxu1 }
 0x332   : > { %v1617_v63 = vpop.f32.mrb[1].mxu1  ;;  %v477_v0 = vsel %vm476_vm4, %v2407_v62, -inf }
 0x333   : > { %478 = vmax.xlane.f32.xlu1 %v477_v0  ;;  %v473_v1 = vpop.f32.mrb[2].mxu1 }
 0x334   : > { %v1618_v2 = vpop.f32.mrb[3].mxu1 }
 0x339   : > { %v585_v3 = vpop.f32.mrb[4].mxu1 }
 0x33a   : > { %v1629_v4 = vpop.f32.mrb[5].mxu1  ;;  %v591_v5 = vsel %vm476_vm4, %v585_v3, -inf }
 0x33b   : > { %592 = vmax.xlane.f32.xlu0 %v591_v5  ;;  %v588_v6 = vpop.f32.mrb[6].mxu1 }
 0x33c   : > { %v1630_v7 = vpop.f32.mrb[7].mxu1 }
 0x341   : > { %v2412_v8 = vpop.f32.mrb[8].mxu1 }
 0x342   : > { %v1641_v9 = vpop.f32.mrb[9].mxu1  ;;  %v707_v10 = vsel %vm476_vm4, %v2412_v8, -inf }
 0x343   : > { %708 = vmax.xlane.f32.xlu0 %v707_v10  ;;  %v704_v11 = vpop.f32.mrb[10].mxu1 }
 0x344   : > { %717 = vrot.lane.b32.xlu1 %v2361_v36, %s2091_s19  ;;  %v1642_v12 = vpop.f32.mrb[11].mxu1 }
 0x349   : > { %v2417_v13 = vpop.f32.mrb[12].mxu1 }
 0x34a   : > { %v1653_v14 = vpop.f32.mrb[13].mxu1  ;;  %v823_v30 = vsel %vm476_vm4, %v2417_v13, -inf }
 0x34b   : > { %v820_v15 = vpop.f32.mrb[14].mxu1 }
 0x34c   : > { %v1654_v16 = vpop.f32.mrb[15].mxu1 }
 0x351   : > { %v2419_v17 = vpop.f32.mrb[16].mxu1 }
 0x352   : > { %v1665_v18 = vpop.f32.mrb[17].mxu1  ;;  %v939_v34 = vsel %vm476_vm4, %v2419_v17, -inf }
 0x353   : > { %v936_v19 = vpop.f32.mrb[18].mxu1 }
 0x354   : > { %v1666_v20 = vpop.f32.mrb[19].mxu1 }
 0x359   : > { %833 = vrot.lane.b32.xlu0 %v2361_v36, %s2092_s12  ;;  %v2422_v21 = vpop.f32.mrb[20].mxu1  ;;  %s1575_s12 = sshll.u32 %s2161_s25, 7  ;;  %s1423_s25 = scalar_lea.sflag [#allocation5], %s2333_s1 }
 0x35a   : > { %v1677_v22 = vpop.f32.mrb[21].mxu1  ;;  %v1055_v39 = vsel %vm476_vm4, %v2422_v21, -inf }
 0x35b   : > { %v1052_v23 = vpop.f32.mrb[22].mxu1 }
 0x35c   : > { %v1678_v24 = vpop.f32.mrb[23].mxu1 }
 0x361   : > { %v2424_v26 = vpop.f32.mrb[24].mxu1 }
 0x362   : > { %v1689_v27 = vpop.f32.mrb[25].mxu1  ;;  %v1171_v37 = vsel %vm476_vm4, %v2424_v26, -inf }
 0x363   : > { %v1168_v28 = vpop.f32.mrb[26].mxu1 }
 0x364   : > { %v1690_v29 = vpop.f32.mrb[27].mxu1 }
 0x368   : > { %824 = vmax.xlane.f32.xlu1 %v823_v30 }
 0x369   : > { %v2428_v31 = vpop.f32.mrb[28].mxu1 }
 0x36a   : > { %v1701_v32 = vpop.f32.mrb[29].mxu1  ;;  %v1287_v38 = vsel %vm476_vm4, %v2428_v31, -inf }
 0x36b   : > { %v1284_v33 = vpop.f32.mrb[30].mxu1 }
 0x36c   : > { %940 = vmax.xlane.f32.xlu1 %v939_v34  ;;  %v1702_v35 = vpop.f32.mrb[31].mxu1 }
 0x370   : > { %1172 = vmax.xlane.f32.xlu1 %v1171_v37 }
 0x374   : > { %1288 = vmax.xlane.f32.xlu1 %v1287_v38 }
 0x378   : > { %1056 = vmax.xlane.f32.xlu0 %v1055_v39 }
 0x385   : > { %949 = vrot.lane.b32.xlu1 %v2361_v36, %s2093_s15  ;;  %s310_s15 = scalar_lea.vmem [#allocation11], %s1548_s10 }
 0x38e   : > { %1065 = vrot.lane.b32.xlu0 %v2361_v36, %s2094_s11  ;;  %s1436_s11 = sshll.u32 %s310_s15, 4  ;;  %s2510_s11 = int_to_ptr.vmem [resolvable:$true] %s1436_s11 }
 0x392   : > { %1181 = vrot.lane.b32.xlu0 %v2361_v36, %s2095_s17 }
 0x396   : > { %1297 = vrot.lane.b32.xlu0 %v2361_v36, %s2096_s18  ;;  %v607_v36 = vsel %vm493_vm3, %v602_v40, 0 }
 0x3c0   : > { %v479_v41 = vpop.xlane.xlu1 %478 }
 0x3c1   : > { %v480_v42 = vsub.f32 %v2407_v62, %v479_v41 }
 0x3c3   : > { %v481_v43 = vmul.f32 1.442695, %v480_v42 }
 0x3c4   : > { %v718_v53 = vpop.permute.xlu1 %717 }
 0x3c5   : > { %1840 = vpow2.f32 %v481_v43  ;;  %v723_v56 = vsel %vm493_vm3, %v718_v53, 0 }
 0x3c8   : > { %v593_v44 = vpop.xlane.xlu0 %592 }
 0x3c9   : > { %v594_v45 = vsub.f32 %v585_v3, %v593_v44 }
 0x3cb   : > { %v595_v46 = vmul.f32 1.442695, %v594_v45 }
 0x3cd   : > { %1842 = vpow2.f32 %v595_v46 }
 0x3cf   : > { %v2443_v47 = vpop.eup %1840 }
 0x3d0   : > { %v709_v48 = vpop.xlane.xlu0 %708  ;;  %v486_v49 = vpack.c.bf16 %v2443_v47, %v2443_v47 }
 0x3d1   : > { %v710_v50 = vsub.f32 %v2412_v8, %v709_v48 }
 0x3d2   : > { %1622 = vmatmul.mubr.msk.bf16.vlgmr.msra.gmra.mrb[4].mxu0 %vm476_vm4, %v486_v49 }
 0x3d3   : > { %v711_v51 = vmul.f32 1.442695, %v710_v50  ;;  %1632 = vmatpush3.bf16.msra.mxu0 %v607_v36  ;;  %1633 = vmatprep.mubr.msk.bf16.mxu0 %vm2074_vm1, %v2073_v25 }
 0x3d4   : > { %1643 = vmatprep.subr.bf16.mxu0 %v2073_v25  ;;  %v834_v58 = vpop.permute.xlu0 %833 }
 0x3d5   : > { %1844 = vpow2.f32 %v711_v51  ;;  %v839_v61 = vsel %vm493_vm3, %v834_v58, 0 }
 0x3d7   : > { %v1843_v52 = vpop.eup %1842 }
 0x3d8   : > { %v597_v54 = vsel %vm476_vm4, %v1843_v52, 0.0  ;;  %v600_v55 = vpack.c.bf16 %v1843_v52, %v1843_v52 }
 0x3d9   : > { %598 = vadd.xlane.f32.xlu1 %v597_v54 }
 0x3da   : > { %1634 = vmatmul.mubr.msk.bf16.vlgmr.msra.gmra.mrb[8].mxu0 %vm476_vm4, %v600_v55 }
 0x3db   : > { %1644 = vmatpush3.bf16.msra.mxu0 %v723_v56  ;;  %1645 = vmatprep.mubr.msk.bf16.mxu0 %vm2074_vm1, %v2073_v25 }
 0x3dc   : > { %1655 = vmatprep.subr.bf16.mxu0 %v2073_v25 }
 0x3df   : > { %v1845_v57 = vpop.eup %1844 }
 0x3e0   : > { %v713_v59 = vsel %vm476_vm4, %v1845_v57, 0.0  ;;  %v716_v60 = vpack.c.bf16 %v1845_v57, %v1845_v57 }
 0x3e1   : > { %714 = vadd.xlane.f32.xlu0 %v713_v59 }
 0x3e2   : > { %1646 = vmatmul.mubr.msk.bf16.vlgmr.msra.gmra.mrb[12].mxu0 %vm476_vm4, %v716_v60 }
 0x3e3   : > { %1656 = vmatpush3.bf16.msra.mxu0 %v839_v61  ;;  %1657 = vmatprep.mubr.msk.bf16.mxu0 %vm2074_vm1, %v2073_v25 }
 0x3e4   : > { %1667 = vmatprep.subr.bf16.mxu0 %v2073_v25 }
 0x3f5   : > { %v825_v62 = vpop.xlane.xlu1 %824 }
 0x3f6   : > { %v826_v63 = vsub.f32 %v2417_v13, %v825_v62 }
 0x3f8   : > { %v827_v0 = vmul.f32 1.442695, %v826_v63 }
 0x3f9   : > { %v941_v1 = vpop.xlane.xlu1 %940 }
 0x3fa   : > { %1846 = vpow2.f32 %v827_v0  ;;  %v942_v2 = vsub.f32 %v2419_v17, %v941_v1 }
 0x3fc   : > { %v943_v3 = vmul.f32 1.442695, %v942_v2 }
 0x3fd   : > { %v1173_v4 = vpop.xlane.xlu1 %1172 }
 0x3fe   : > { %1848 = vpow2.f32 %v943_v3  ;;  %v1174_v5 = vsub.f32 %v2424_v26, %v1173_v4  ;;  %v483_v26 = vsel %vm476_vm4, %v2443_v47, 0.0 }
 0x400   : > { %v1175_v6 = vmul.f32 1.442695, %v1174_v5 }
 0x401   : > { %v1289_v7 = vpop.xlane.xlu1 %1288 }
 0x402   : > { %1850 = vpow2.f32 %v1175_v6  ;;  %v1290_v9 = vsub.f32 %v2428_v31, %v1289_v7 }
 0x404   : > { %v1847_v8 = vpop.eup %1846  ;;  %v1291_v17 = vmul.f32 1.442695, %v1290_v9 }
 0x405   : > { %v1057_v10 = vpop.xlane.xlu0 %1056  ;;  %v950_v11 = vpop.permute.xlu1 %949  ;;  %v829_v12 = vsel %vm476_vm4, %v1847_v8, 0.0  ;;  %v832_v13 = vpack.c.bf16 %v1847_v8, %v1847_v8 }
 0x406   : > { %v1058_v14 = vsub.f32 %v2422_v21, %v1057_v10  ;;  %v955_v15 = vsel %vm493_vm3, %v950_v11, 0  ;;  %830 = vadd.xlane.f32.xlu0 %v829_v12 }
 0x407   : > { %1658 = vmatmul.mubr.msk.bf16.vlgmr.msra.gmra.mrb[16].mxu0 %vm476_vm4, %v832_v13 }
 0x408   : > { %v1849_v16 = vpop.eup %1848  ;;  %v1059_v18 = vmul.f32 1.442695, %v1058_v14  ;;  %1668 = vmatpush3.bf16.msra.mxu0 %v955_v15  ;;  %1669 = vmatprep.mubr.msk.bf16.mxu0 %vm2074_vm1, %v2073_v25 }
 0x409   : > { %v945_v19 = vsel %vm476_vm4, %v1849_v16, 0.0  ;;  %1679 = vmatprep.subr.bf16.mxu0 %v2073_v25  ;;  %v1066_v21 = vpop.permute.xlu0 %1065  ;;  %v948_v23 = vpack.c.bf16 %v1849_v16, %v1849_v16 }
 0x40a   : > { %1852 = vpow2.f32 %v1059_v18  ;;  %946 = vadd.xlane.f32.xlu1 %v945_v19  ;;  %v1071_v24 = vsel %vm493_vm3, %v1066_v21, 0  ;;  %v1838_v18 = vld [vmem:[#allocation8] sm:$0xff]   ;;  %v1839_v21 = vld [vmem:[#allocation8 + $0x8] sm:$0xff]  }
 0x40b   : > { %1854 = vpow2.f32 %v1291_v17  ;;  %1710 = vmatpush3.bf16.msra.mxu1 %v1838_v18 }
 0x40c   : > { %v1851_v20 = vpop.eup %1850  ;;  %1711 = vmatprep.subr.bf16.mxu1 %v2073_v25 }
 0x40d   : > { %v1177_v22 = vsel %vm476_vm4, %v1851_v20, 0.0  ;;  %v1182_v28 = vpop.permute.xlu0 %1181  ;;  %v1180_v35 = vpack.c.bf16 %v1851_v20, %v1851_v20 }
 0x40e   : > { %1178 = vadd.xlane.f32.xlu1 %v1177_v22  ;;  %v1187_v32 = vsel %vm493_vm3, %v1182_v28, 0 }
 0x40f   : > { %1670 = vmatmul.mubr.msk.bf16.vlgmr.msra.gmra.mrb[20].mxu0 %vm476_vm4, %v948_v23  ;;  %1712 = vmatpush3.bf16.msra.mxu1 %v1839_v21 }
 0x410   : > { %1680 = vmatpush3.bf16.msra.mxu0 %v1071_v24  ;;  %1681 = vmatprep.mubr.msk.bf16.mxu0 %vm2074_vm1, %v2073_v25 }
 0x411   : > { %1691 = vmatprep.subr.bf16.mxu0 %v2073_v25  ;;  %v1298_v34 = vpop.permute.xlu0 %1297 }
 0x412   : > { %484 = vadd.xlane.f32.xlu1 %v483_v26  ;;  %v1303_v37 = vsel %vm493_vm3, %v1298_v34, 0 }
 0x414   : > { %v1853_v27 = vpop.eup %1852 }
 0x415   : > { %v1061_v29 = vsel %vm476_vm4, %v1853_v27, 0.0  ;;  %v1064_v30 = vpack.c.bf16 %v1853_v27, %v1853_v27  ;;  %v1855_v31 = vpop.eup %1854 }
 0x416   : > { %1062 = vadd.xlane.f32.xlu0 %v1061_v29  ;;  %v1293_v33 = vsel %vm476_vm4, %v1855_v31, 0.0  ;;  %v1296_v38 = vpack.c.bf16 %v1855_v31, %v1855_v31 }
 0x417   : > { %1682 = vmatmul.mubr.msk.bf16.vlgmr.msra.gmra.mrb[24].mxu0 %vm476_vm4, %v1064_v30 }
 0x418   : > { %1692 = vmatpush3.bf16.msra.mxu0 %v1187_v32  ;;  %1693 = vmatprep.mubr.msk.bf16.mxu0 %vm2074_vm1, %v2073_v25 }
 0x419   : > { %1703 = vmatprep.subr.bf16.mxu0 %v2073_v25 }
 0x41a   : > { %1294 = vadd.xlane.f32.xlu0 %v1293_v33 }
 0x41f   : > { %1694 = vmatmul.mubr.msk.bf16.vlgmr.msra.gmra.mrb[28].mxu0 %vm476_vm4, %v1180_v35 }
 0x420   : > { %1704 = vmatpush3.bf16.msra.mxu0 %v1303_v37  ;;  %1705 = vmatprep.mubr.msk.bf16.mxu0 %vm2074_vm1, %v2073_v25 }
 0x427   : > { %1706 = vmatmul.mubr.msk.bf16.vlgmr.msra.gmra.mrb[32].mxu0 %vm476_vm4, %v1296_v38 }
 0x466   : > { %v599_v39 = vpop.xlane.xlu1 %598 }
 0x46e   : > { %v715_v46 = vpop.xlane.xlu0 %714 }
 0x493   : > { %v831_v61 = vpop.xlane.xlu0 %830 }
 0x497   : > { %v947_v40 = vpop.xlane.xlu1 %946 }
 0x49b   : > { %v1179_v41 = vpop.xlane.xlu1 %1178 }
 0x49f   : > { %v485_v42 = vpop.xlane.xlu1 %484 }
 0x4a0   : > { %1856 = vrcp.f32 %v485_v42  ;;  %v1570_v42 = vld [vmem:[%s2557_s4] ss:$0 sm:$0xff] }
 0x4a1   : > { %1858 = vrcp.f32 %v599_v39 }
 0x4a2   : > { %1860 = vrcp.f32 %v715_v46 }
 0x4a3   : > { %1862 = vrcp.f32 %v831_v61  ;;  %v1063_v3 = vpop.xlane.xlu0 %1062 }
 0x4a4   : > { %1864 = vrcp.f32 %v947_v40 }
 0x4a5   : > { %v531_v43 = vpop.f32.mrb[4].mxu0  ;;  %1866 = vrcp.f32 %v1063_v3 }
 0x4a6   : > { %v1623_v44 = vpop.f32.mrb[5].mxu0  ;;  %1868 = vrcp.f32 %v1179_v41 }
 0x4a7   : > { %v534_v45 = vpop.f32.mrb[6].mxu0  ;;  %v1295_v16 = vpop.xlane.xlu0 %1294 }
 0x4a8   : > { %v1624_v47 = vpop.f32.mrb[7].mxu0  ;;  %1870 = vrcp.f32 %v1295_v16 }
 0x4aa   : > { %v1857_v48 = vpop.eup %1856 }
 0x4ab   : > { %v538_v49 = vmul.f32 %v1857_v48, %v531_v43  ;;  %v1859_v50 = vpop.eup %1858 }
 0x4ac   : > { %v1861_v55 = vpop.eup %1860 }
 0x4ad   : > { %539 = vst.msk [vmem:[#allocation2] sm:$0xff] %vm429_vm2, %v538_v49  ;;  %v643_v36 = vpop.f32.mrb[8].mxu0  ;;  %v1863_v62 = vpop.eup %1862 }
 0x4ae   : > { %v650_v51 = vmul.f32 %v1859_v50, %v643_v36  ;;  %v1635_v52 = vpop.f32.mrb[9].mxu0  ;;  %v1865_v5 = vpop.eup %1864 }
 0x4af   : > { %v646_v53 = vpop.f32.mrb[10].mxu0  ;;  %v1867_v11 = vpop.eup %1866 }
 0x4b0   : > { %v1636_v54 = vpop.f32.mrb[11].mxu0  ;;  %652 = vrot.lane.b32.xlu0 %v650_v51, %s2097_s7  ;;  %v1869_v19 = vpop.eup %1868  ;;  %s2508_s7 = scalar_lea.hbm %s2559_s6, %s1575_s12 }
 0x4b2   : > { %v1871_v27 = vpop.eup %1870 }
 0x4b5   : > { %v759_v56 = vpop.f32.mrb[12].mxu0 }
 0x4b6   : > { %v766_v57 = vmul.f32 %v1861_v55, %v759_v56  ;;  %v1647_v58 = vpop.f32.mrb[13].mxu0 }
 0x4b7   : > { %v762_v59 = vpop.f32.mrb[14].mxu0 }
 0x4b8   : > { %v1648_v60 = vpop.f32.mrb[15].mxu0  ;;  %768 = vrot.lane.b32.xlu1 %v766_v57, %s2098_s26  ;;  %s1986_s26 = scalar_lea.vmem %s2510_s11, 128 }
 0x4b9   : > { %p1987_p10 = scmp.ne.s32.totalorder %s2510_s11, %s1986_s26 }
 0x4bb   : > { %p1988_p3 = pnand %p1987_p10, %p2288_p5 }
 0x4bd   : > { %p1989_p7 = pneg %p1988_p3 }
 0x4da   : > { %v875_v63 = vpop.f32.mrb[16].mxu0 }
 0x4db   : > { %v882_v0 = vmul.f32 %v1863_v62, %v875_v63  ;;  %v1659_v1 = vpop.f32.mrb[17].mxu0 }
 0x4dc   : > { %v878_v2 = vpop.f32.mrb[18].mxu0 }
 0x4dd   : > { %v1660_v4 = vpop.f32.mrb[19].mxu0  ;;  %884 = vrot.lane.b32.xlu1 %v882_v0, %s2099_s16  ;;  %s2104_s16 = smov [#allocation11]  }
 0x4e2   : > { %v991_v6 = vpop.f32.mrb[20].mxu0 }
 0x4e3   : > { %v998_v7 = vmul.f32 %v1865_v5, %v991_v6  ;;  %v1671_v8 = vpop.f32.mrb[21].mxu0 }
 0x4e4   : > { %v994_v9 = vpop.f32.mrb[22].mxu0 }
 0x4e5   : > { %v1672_v10 = vpop.f32.mrb[23].mxu0  ;;  %1000 = vrot.lane.b32.xlu0 %v998_v7, %s2100_s8  ;;  %s1990_s8 = sshll.u32 %s2104_s16, 4  ;;  %s1991_s8 = int_to_ptr.vmem [resolvable:$false] %s1990_s8 }
 0x4e6   : > { %p1993_p12 = scmp.lt.s32.totalorder %s2510_s11, %s1991_s8 }
 0x4ea   : > { %v1107_v12 = vpop.f32.mrb[24].mxu0 }
 0x4eb   : > { %v1114_v13 = vmul.f32 %v1867_v11, %v1107_v12  ;;  %v1683_v14 = vpop.f32.mrb[25].mxu0 }
 0x4ec   : > { %v1110_v15 = vpop.f32.mrb[26].mxu0 }
 0x4ed   : > { %1116 = vrot.lane.b32.xlu1 %v1114_v13, %s2101_s27  ;;  %v1684_v17 = vpop.f32.mrb[27].mxu0  ;;  %s1992_s27 = scalar_lea.vmem %s1991_s8, 256 }
 0x4ee   : > { %p1994_p1 = scmp.lt.s32.totalorder %s1992_s27, %s1986_s26 }
 0x4f0   : > { %p1995_p2 = por %p1994_p1, %p1993_p12 }
 0x4f2   : > { %v1223_v20 = vpop.f32.mrb[28].mxu0  ;;  %p1996_p4 = pnand %p1995_p2, %p1989_p7 }
 0x4f3   : > { %v1230_v22 = vmul.f32 %v1869_v19, %v1223_v20  ;;  %v1695_v23 = vpop.f32.mrb[29].mxu0 }
 0x4f4   : > { %v1226_v24 = vpop.f32.mrb[30].mxu0 }
 0x4f5   : > { %v1696_v26 = vpop.f32.mrb[31].mxu0  ;;  %1232 = vrot.lane.b32.xlu0 %v1230_v22, %s2102_s29 }
 0x4fa   : > { %v1339_v28 = vpop.f32.mrb[32].mxu0 }
 0x4fb   : > { %v1346_v29 = vmul.f32 %v1871_v27, %v1339_v28  ;;  %v1707_v30 = vpop.f32.mrb[33].mxu0 }
 0x4fc   : > { %v1342_v31 = vpop.f32.mrb[34].mxu0 }
 0x4fd   : > { %1348 = vrot.lane.b32.xlu1 %v1346_v29, %s2103_s13  ;;  %v1708_v32 = vpop.f32.mrb[35].mxu0 }
 0x522   : > { %v653_v33 = vpop.permute.xlu0 %652 }
 0x523   : > { %656 = vst.msk [vmem:[#allocation2] sm:$0xff] %vm655_vm5, %v653_v33 }
 0x52a   : > { %v769_v34 = vpop.permute.xlu1 %768 }
 0x52b   : > { %772 = vst.msk [vmem:[#allocation2] sm:$0xff] %vm771_vm6, %v769_v34 }
 0x54f   : > { %v885_v25 = vpop.permute.xlu1 %884 }
 0x550   : > { %888 = vst.msk [vmem:[#allocation2] sm:$0xff] %vm887_vm7, %v885_v25 }
 0x557   : > { %v1001_v35 = vpop.permute.xlu0 %1000 }
 0x558   : > { %1004 = vst.msk [vmem:[#allocation2] sm:$0xff] %vm1003_vm8, %v1001_v35 }
 0x55f   : > { %v1117_v37 = vpop.permute.xlu1 %1116 }
 0x560   : > { %1120 = vst.msk [vmem:[#allocation2] sm:$0xff] %vm1119_vm9, %v1117_v37 }
 0x567   : > { %v1233_v38 = vpop.permute.xlu0 %1232 }
 0x568   : > { %1236 = vst.msk [vmem:[#allocation2] sm:$0xff] %vm1235_vm10, %v1233_v38 }
 0x56f   : > { %v1349_v39 = vpop.permute.xlu1 %1348 }
 0x570   : > { %1352 = vst.msk [vmem:[#allocation2] sm:$0xff] %vm1351_vm11, %v1349_v39 }
 0x577   : > { %v1353_v40 = vld [vmem:[#allocation2] sm:$0xff] }
 0x578   : > { %v1354_v41 = vpack.c.bf16 %v1353_v40, %v1353_v40 }
 0x57a   : > { %1714 = vmatmul.mubr.msk.bf16.vlgmr.msra.gmra.mrb[32].mxu1 %vm349_vm0, %v1354_v41 }
 0x64d   : > { %v1415_v43 = vpop.f32.mrb[32].mxu1 }
 0x64e   : > { %v1416_v44 = vadd.f32 %v1570_v42, %v1415_v43  ;;  %v1715_v45 = vpop.f32.mrb[33].mxu1 }
 0x64f   : > { %v1418_v46 = vpop.f32.mrb[34].mxu1 }
 0x650   : > { %v1716_v47 = vpop.f32.mrb[35].mxu1  ;;  %1421 = vst.msk [vmem:[%s310_s15] sm:$0xff] %vm349_vm0, %v1416_v44 }
 0x651   : > { %1999 = shalt.err (!%p1996_p4)
}
 0x652   : > { %s2000_s1 = scalar_lea.hbm %s2508_s7, 128  ;;  %s2004_s10 = scalar_lea.hbm %s2559_s6, 256 }
 0x653   : > { %p2001_p0 = scmp.ne.s32.totalorder %s2508_s7, %s2000_s1  ;;  %p2005_p11 = scmp.lt.u32.totalorder %s2508_s7, %s2559_s6 }
 0x654   : > { %p2006_p13 = scmp.lt.u32.totalorder %s2004_s10, %s2000_s1  ;;  %p2008_p10 = scmp.lt.u32.totalorder %s2000_s1, %s2508_s7 }
 0x655   : > { %p2002_p9 = pnand %p2001_p0, %p2288_p5 }
 0x656   : > { %p2007_p6 = por %p2006_p13, %p2005_p11 }
 0x657   : > { %p2003_p8 = pneg %p2002_p9 }
 0x658   : > { %p2009_p3 = por %p2008_p10, %p2007_p6 }
 0x65a   : > { %p2010_p7 = pnand %p2009_p3, %p2003_p8 }
 0x65c   : > { %2013 = shalt.err (!%p2010_p7)
}
 0x65d   : > { %1731 = dma.vmem_to_hbm [thread:$0]  (%p2288_p5), %s2510_s11, 128, %s2508_s7, %s1423_s25  }
 0x65e PF: > { %s1448_s12 = sand.u32 1, %s2048_s21   ;;  %p2583_p12 = scmp.ne.s32.totalorder %s2567_s28, 0 }
 0x65f   : > { %p2584_p1 = scmp.ge.s32.totalorder %s2060_s24, 2  ;;  %s1449_s15 = scalar_lea.sflag [#allocation5], %s1448_s12 }
 0x661   : > { %p1748_p2 = pnand %p2584_p1, %p2583_p12 }
 0x663   : > { %2043 = dma.done.wait (!%p1748_p2), %s1449_s15, 128  }
 0x664   : > { %2045 = vsyncadd (!%p1748_p2), %s1449_s15, 4294967168  ;;  %p21_p4 = scmp.ge.s32.totalorder %s2253_s14, 4   ;;  %s2585_s21 = smov %s2052_s22 }
 0x665   : > { %s2586_s22 = smov %s2056_s23  ;;  %s2587_s23 = smov %s2284_s30 }
 0x666   : > { %s2588_s24 = smov %s2253_s14  ;;  %23 = sbr.rel (!%p21_p4) target bundleno = 9 (0x9), region = 104 }
 0x66d   :  { %1454 = vsyncpa [#allocation4], 1 }
 0x66e   :  { %1456 = vsyncpa [#allocation4 + $0x1], 1 }
 0x66f   :  { %1457 = vsyncpa [#allocation7], 1 }
 0x670   :  { %1458 = vsyncpa [#allocation10], 1 }
 0x671   :  { %1459 = vsyncpa [#allocation5], 1 }
 0x672   :  { %1461 = vsyncpa [#allocation5 + $0x1], 1 }

</bundles_post_ra>
